<compile_context>
chip_gen: v7x
topology: tpu7x:2x2x1
jax: 0.10.0
libtpu: 0.0.40
codegen_flags: <defaults>
</compile_context>

<pallas_src>
import functools

import jax
import jax.numpy as jnp
from jax.experimental import pallas as pl
from jax.experimental.pallas import tpu as pltpu


def _erf_f32(x):
    """Abramowitz & Stegun 7.1.26 erf (|abs err| <= 1.5e-7).

    The divide is an EUP approx-reciprocal + one Newton step so the saturated
    VALU slot is not burdened with a full-precision divide sequence.
    """
    a1 = jnp.float32(0.254829592)
    a2 = jnp.float32(-0.284496736)
    a3 = jnp.float32(1.421413741)
    a4 = jnp.float32(-1.453152027)
    a5 = jnp.float32(1.061405429)
    p = jnp.float32(0.3275911)
    s = jnp.where(x < 0.0, jnp.float32(-1.0), jnp.float32(1.0))
    ax = jnp.abs(x)
    y = 1.0 + p * ax
    t = pl.reciprocal(y, approx=True)
    t = t * (2.0 - y * t)          # 1 NR step: rel err ~ eps^2, safely << 1e-6
    poly = ((((a5 * t + a4) * t + a3) * t + a2) * t + a1) * t
    return s * (1.0 - poly * jnp.exp(-ax * ax))


def _gelu_exact(z):
    return 0.5 * z * (1.0 + _erf_f32(z * jnp.float32(0.7071067811865476)))


def _msconv2d_kernel(x_ref, w1_ref, wd_ref, bias_ref, gamma_ref, beta_ref, rc_ref,
                     out_ref, *, groups, gps, gc, N, H, W):
    # x_ref    : (gps, N*gc, H*W)  packed input slab(s): sublane = N*gc, lane = H*W
    # w1_ref   : (gc, gc)          1x1 conv weight (out, in), group 0 only
    # wd_ref   : (gps, N*gc, 9)    per-channel depthwise taps (zeros row for group 0)
    # bias_ref : (gps, N*gc, 1)
    # gamma_ref/beta_ref : (gps, gc, 1)   BatchNorm affine params
    # rc_ref   : (2, H*W) int32    [row, col] index of every flattened-spatial lane
    # out_ref  : (gps, N*gc, H*W)
    HW = H * W
    inv_cnt = jnp.float32(1.0 / (N * H * W))
    eps = jnp.float32(1e-5)
    row = rc_ref[0:1, :]                       # (1, HW) int32
    col = rc_ref[1:2, :]

    def conv1x1(x, bias):
        # Dense 1x1 conv over gc channels, exact f32 on the VPU.  N independent
        # accumulator chains; work-optimal (N*gc*gc*HW MACs).  For large gc this
        # would become a single MXU jnp.dot against a block-diagonal weight.
        w1 = w1_ref[...]                       # (gc, gc)
        ys = []
        for n in range(N):
            xn = x[n * gc:(n + 1) * gc]        # (gc, HW)
            acc_n = None
            for ci in range(gc):
                term = w1[:, ci:ci + 1] * xn[ci:ci + 1, :]
                acc_n = term if acc_n is None else acc_n + term
            ys.append(acc_n)
        return jnp.concatenate(ys, axis=0) + bias

    def depthwise(x, d, wtap, bias):
        # 3x3 depthwise conv, dilation d, on the dense flattened-spatial lane axis:
        # each tap = lane roll (XLU slot) + boundary mask (VPU select).  Row masks
        # are applied before the column rolls (any row-wrap positions are zeroed by
        # the column mask anyway), so only 8 rolls and 8 selects per group.
        parts = []
        for kh in range(3):
            dh = (kh - 1) * d
            if dh == 0:
                xr = x
            else:
                xr = pltpu.roll(x, shift=(-dh * W) % HW, axis=1)
                xr = jnp.where((row >= d) if dh < 0 else (row < H - d), xr, 0.0)
            acc = None
            for kw in range(3):
                dw = (kw - 1) * d
                if dw == 0:
                    tap = xr
                else:
                    tap = pltpu.roll(xr, shift=(-dw) % HW, axis=1)
                    tap = jnp.where((col >= d) if dw < 0 else (col < W - d), tap, 0.0)
                term = wtap[:, 3 * kh + kw:3 * kh + kw + 1] * tap
                acc = term if acc is None else acc + term
            parts.append(acc)
        return (parts[0] + parts[1]) + (parts[2] + bias)

    def bn_gelu(y, gamma, beta):
        # Exact per-channel training-mode BatchNorm stats: single unmasked pass
        # (dense layout => no pad columns).  Channels live on sublanes, replicated
        # over the batch (row n*gc + c).
        rs = jnp.sum(y, axis=-1, keepdims=True)          # (N*gc, 1)
        rss = jnp.sum(y * y, axis=-1, keepdims=True)
        s_c, ss_c = rs[0:gc], rss[0:gc]
        for n in range(1, N):
            s_c = s_c + rs[n * gc:(n + 1) * gc]
            ss_c = ss_c + rss[n * gc:(n + 1) * gc]
        mean = s_c * inv_cnt                              # (gc, 1)
        var = jnp.maximum(ss_c * inv_cnt - mean * mean, 0.0)   # biased var
        scale = jax.lax.rsqrt(var + eps) * gamma
        shift = beta - mean * scale
        scale = jnp.concatenate([scale] * N, axis=0)      # (N*gc, 1)
        shift = jnp.concatenate([shift] * N, axis=0)
        return _gelu_exact(y * scale + shift)

    def handle_step(step_val):
        for j in range(gps):
            g = step_val * gps + j                         # static python int
            x = x_ref[j]                                   # (N*gc, HW)
            if g == 0:
                y = conv1x1(x, bias_ref[j])
            else:
                y = depthwise(x, g, wd_ref[j], bias_ref[j])
            # BN-affine + GELU fused with the single full-width store.
            out_ref[j] = bn_gelu(y, gamma_ref[j], beta_ref[j])

    num_steps = groups // gps
    if num_steps == 1:
        handle_step(0)
    else:
        step = pl.program_id(0)
        for sv in range(num_steps):
            @pl.when(step == sv)
            def _(sv=sv):
                handle_step(sv)


@functools.partial(jax.jit, static_argnames=("groups", "num_steps"))
def ms_conv2d(x, w1_t, b1_t, wd_t, bd_t, gamma, beta, *, groups=4, num_steps=None):
    """MSConv2d forward (training-mode BatchNorm).

    x: (N, C, H, W) f32.  Params in PyTorch layouts: w1_t (gc, gc, 1, 1), b1_t (gc,),
    wd_t (groups-1, gc, 1, 3, 3), bd_t (groups-1, gc), gamma/beta (C,).
    `num_steps` (divisor of groups) controls the "parallel" grid: 1 = fully unrolled
    (best for small shapes on single-TC v5e/v6e), 2 or `groups` to split across v7x
    TensorCores / bound per-step VMEM for large shapes.
    """
    N, C, H, W = x.shape
    assert C % groups == 0
    gc = C // groups
    NG = N * gc
    HW = H * W
    # TODO(synk): support H*W not a multiple of 128 (needs a lane pad + pad masks
    # for the roll-based taps and BN sums).
    assert HW % 128 == 0, "flattened spatial extent must be a multiple of 128"
    f32 = jnp.float32

    if num_steps is None:
        num_steps = 1 if (groups * NG * HW * 4) <= (2 << 20) else groups
    assert groups % num_steps == 0
    gps = groups // num_steps

    # --- tiny parameter re-layouts (O(C*9)), no activation-sized HBM passes ---
    w1_k = w1_t[:, :, 0, 0].astype(f32)                           # (gc_out, gc_in)
    wd_r = wd_t[:, :, 0].astype(f32).reshape(groups - 1, gc, 9)
    wd_k = jnp.concatenate([jnp.zeros((1, NG, 9), f32),
                            jnp.tile(wd_r, (1, N, 1))], axis=0)   # (groups, NG, 9)
    b1_k = jnp.tile(b1_t.astype(f32), (N,))                       # (NG,)
    bd_k = jnp.tile(bd_t.astype(f32), (1, N))                     # (groups-1, NG)
    bias_k = jnp.concatenate([b1_k[None, :], bd_k], axis=0)[:, :, None]
    gamma_k = gamma.astype(f32).reshape(groups, gc, 1)
    beta_k = beta.astype(f32).reshape(groups, gc, 1)
    pidx = jnp.arange(HW, dtype=jnp.int32)
    rc = jnp.stack([pidx // W, pidx % W], axis=0)                 # (2, HW) int32

    # --- activation layout: (N, C, H, W) -> (groups, N*gc, H*W): one group's channels
    # (replicated over the batch) pack all 8 sublanes, flat spatial is the lane axis.
    x_k = (x.astype(f32).reshape(N, groups, gc, HW)
           .transpose(1, 0, 2, 3).reshape(groups, NG, HW))

    kernel = functools.partial(_msconv2d_kernel, groups=groups, gps=gps, gc=gc,
                               N=N, H=H, W=W)
    macs = N * H * W * (gc * gc + 9 * gc * (groups - 1))
    cost = pl.CostEstimate(flops=2 * macs,
                           transcendentals=2 * N * C * H * W,
                           bytes_accessed=2 * N * C * H * W * 4)

    out = pl.pallas_call(
        kernel,
        out_shape=jax.ShapeDtypeStruct((groups, NG, HW), f32),
        grid=(num_steps,),
        in_specs=[
            pl.BlockSpec((gps, NG, HW), lambda s: (s, 0, 0)),     # x slab(s)
            pl.BlockSpec((gc, gc), lambda s: (0, 0)),             # 1x1 conv weight
            pl.BlockSpec((gps, NG, 9), lambda s: (s, 0, 0)),      # depthwise taps
            pl.BlockSpec((gps, NG, 1), lambda s: (s, 0, 0)),      # bias
            pl.BlockSpec((gps, gc, 1), lambda s: (s, 0, 0)),      # BN gamma
            pl.BlockSpec((gps, gc, 1), lambda s: (s, 0, 0)),      # BN beta
            pl.BlockSpec((2, HW), lambda s: (0, 0)),              # row/col lane indices
        ],
        out_specs=pl.BlockSpec((gps, NG, HW), lambda s: (s, 0, 0)),
        compiler_params=pltpu.CompilerParams(
            dimension_semantics=("parallel",)),
        cost_estimate=cost,
    )(x_k, w1_k, wd_k, bias_k, gamma_k, beta_k, rc)

    return (out.reshape(groups, N, gc, HW).transpose(1, 0, 2, 3)
            .reshape(N, C, H, W))


def _reference(x, w1_t, b1_t, wd_t, bd_t, gamma, beta, groups):
    """Pure-JAX reference mirroring the PyTorch module (training-mode BN)."""
    N, C, H, W = x.shape
    feats = jnp.split(x, groups, axis=1)
    y0 = jnp.einsum("nihw,oi->nohw", feats[0], w1_t[:, :, 0, 0],
                    precision=jax.lax.Precision.HIGHEST) + b1_t[None, :, None, None]
    outs = [y0]
    for i in range(1, groups):
        d = i
        xp = jnp.pad(feats[i], ((0, 0), (0, 0), (d, d), (d, d)))
        acc = jnp.zeros_like(feats[i]) + bd_t[i - 1][None, :, None, None]
        for kh in range(3):
            for kw in range(3):
                acc = acc + (wd_t[i - 1][:, 0, kh, kw][None, :, None, None]
                             * xp[:, :, kh * d:kh * d + H, kw * d:kw * d + W])
        outs.append(acc)
    net = jnp.concatenate(outs, axis=1)
    mean = net.mean(axis=(0, 2, 3), keepdims=True)
    var = ((net - mean) ** 2).mean(axis=(0, 2, 3), keepdims=True)
    nh = (net - mean) * jax.lax.rsqrt(var + 1e-5)
    nh = nh * gamma[None, :, None, None] + beta[None, :, None, None]
    return jax.nn.gelu(nh, approximate=False)


if __name__ == "__main__":
    key = jax.random.PRNGKey(0)
    N, C, H, W = 2, 16, 16, 16
    groups = 4
    gc = C // groups

    ks = jax.random.split(key, 7)
    x = jax.random.normal(ks[0], (N, C, H, W), dtype=jnp.float32)                      # NCHW input
    w1 = 0.2 * jax.random.normal(ks[1], (gc, gc, 1, 1), dtype=jnp.float32)             # Conv2d(gc,gc,1)
    b1 = 0.1 * jax.random.normal(ks[2], (gc,), dtype=jnp.float32)
    wd = 0.2 * jax.random.normal(ks[3], (groups - 1, gc, 1, 3, 3), dtype=jnp.float32)  # depthwise taps
    bd = 0.1 * jax.random.normal(ks[4], (groups - 1, gc), dtype=jnp.float32)
    gamma = 1.0 + 0.1 * jax.random.normal(ks[5], (C,), dtype=jnp.float32)
    beta = 0.1 * jax.random.normal(ks[6], (C,), dtype=jnp.float32)

    out = ms_conv2d(x, w1, b1, wd, bd, gamma, beta, groups=groups)
    out = jax.block_until_ready(out)
    assert out.shape == (N, C, H, W)
    assert bool(jnp.all(jnp.isfinite(out)))

    ref = _reference(x, w1, b1, wd, bd, gamma, beta, groups)
    err = float(jnp.max(jnp.abs(out - ref)))
    assert err < 1e-4, f"max abs err vs reference: {err}"
    print("KERNEL_OK")
</pallas_src>

<mosaic_0001>
module attributes {stable_mosaic.version = 11 : i64} {
  func.func @_msconv2d_kernel(%arg0: i32, %arg1: memref<4x8x256xf32, #tpu.memory_space<vmem>>, %arg2: memref<4x4xf32, #tpu.memory_space<vmem>>, %arg3: memref<4x8x9xf32, #tpu.memory_space<vmem>>, %arg4: memref<4x8x1xf32, #tpu.memory_space<vmem>>, %arg5: memref<4x4x1xf32, #tpu.memory_space<vmem>>, %arg6: memref<4x4x1xf32, #tpu.memory_space<vmem>>, %arg7: memref<2x256xi32, #tpu.memory_space<vmem>>, %arg8: memref<4x8x256xf32, #tpu.memory_space<vmem>>) attributes {dimension_semantics = [#tpu.dimension_semantics<parallel>], iteration_bounds = array<i64: 1>, scalar_prefetch = 0 : i64, scratch_operands = 0 : i64, tpu.core_type = #tpu.core_type<tc>, window_params = [{transform_indices = @transform_0, window_bounds = array<i64: 4, 8, 256>}, {pipeline_mode = #tpu.pipeline_mode<synchronous>, transform_indices = @transform_1, window_bounds = array<i64: 4, 4>}, {transform_indices = @transform_2, window_bounds = array<i64: 4, 8, 9>}, {transform_indices = @transform_3, window_bounds = array<i64: 4, 8, 1>}, {transform_indices = @transform_4, window_bounds = array<i64: 4, 4, 1>}, {transform_indices = @transform_5, window_bounds = array<i64: 4, 4, 1>}, {pipeline_mode = #tpu.pipeline_mode<synchronous>, transform_indices = @transform_6, window_bounds = array<i64: 2, 256>}, {transform_indices = @transform_7, window_bounds = array<i64: 4, 8, 256>}]} {
    %c0 = arith.constant 0 : index
    %c0_0 = arith.constant 0 : index
    %0 = vector.load %arg7[%c0, %c0_0] : memref<2x256xi32, #tpu.memory_space<vmem>>, vector<1x256xi32>
    %c1 = arith.constant 1 : index
    %c0_1 = arith.constant 0 : index
    %1 = vector.load %arg7[%c1, %c0_1] : memref<2x256xi32, #tpu.memory_space<vmem>>, vector<1x256xi32>
    %c0_2 = arith.constant 0 : index
    %c0_3 = arith.constant 0 : index
    %c0_4 = arith.constant 0 : index
    %2 = vector.load %arg1[%c0_2, %c0_3, %c0_4] : memref<4x8x256xf32, #tpu.memory_space<vmem>>, vector<1x8x256xf32>
    %3 = vector.shape_cast %2 : vector<1x8x256xf32> to vector<8x256xf32>
    %c0_5 = arith.constant 0 : index
    %c0_6 = arith.constant 0 : index
    %c0_7 = arith.constant 0 : index
    %4 = vector.load %arg4[%c0_5, %c0_6, %c0_7] : memref<4x8x1xf32, #tpu.memory_space<vmem>>, vector<1x8x1xf32>
    %5 = vector.shape_cast %4 : vector<1x8x1xf32> to vector<8x1xf32>
    %c0_8 = arith.constant 0 : index
    %c0_9 = arith.constant 0 : index
    %6 = vector.load %arg2[%c0_8, %c0_9] : memref<4x4xf32, #tpu.memory_space<vmem>>, vector<4x4xf32>
    %7 = vector.extract_strided_slice %3 {offsets = [0, 0], sizes = [4, 256], strides = [1, 1]} : vector<8x256xf32> to vector<4x256xf32>
    %8 = vector.extract_strided_slice %6 {offsets = [0, 0], sizes = [4, 1], strides = [1, 1]} : vector<4x4xf32> to vector<4x1xf32>
    %9 = vector.extract_strided_slice %7 {offsets = [0, 0], sizes = [1, 256], strides = [1, 1]} : vector<4x256xf32> to vector<1x256xf32>
    %10 = vector.broadcast %8 : vector<4x1xf32> to vector<4x256xf32>
    %11 = vector.broadcast %9 : vector<1x256xf32> to vector<4x256xf32>
    %12 = arith.mulf %10, %11 : vector<4x256xf32>
    %13 = vector.extract_strided_slice %6 {offsets = [0, 1], sizes = [4, 1], strides = [1, 1]} : vector<4x4xf32> to vector<4x1xf32>
    %14 = vector.extract_strided_slice %7 {offsets = [1, 0], sizes = [1, 256], strides = [1, 1]} : vector<4x256xf32> to vector<1x256xf32>
    %15 = vector.broadcast %13 : vector<4x1xf32> to vector<4x256xf32>
    %16 = vector.broadcast %14 : vector<1x256xf32> to vector<4x256xf32>
    %17 = arith.mulf %15, %16 : vector<4x256xf32>
    %18 = arith.addf %12, %17 : vector<4x256xf32>
    %19 = vector.extract_strided_slice %6 {offsets = [0, 2], sizes = [4, 1], strides = [1, 1]} : vector<4x4xf32> to vector<4x1xf32>
    %20 = vector.extract_strided_slice %7 {offsets = [2, 0], sizes = [1, 256], strides = [1, 1]} : vector<4x256xf32> to vector<1x256xf32>
    %21 = vector.broadcast %19 : vector<4x1xf32> to vector<4x256xf32>
    %22 = vector.broadcast %20 : vector<1x256xf32> to vector<4x256xf32>
    %23 = arith.mulf %21, %22 : vector<4x256xf32>
    %24 = arith.addf %18, %23 : vector<4x256xf32>
    %25 = vector.extract_strided_slice %6 {offsets = [0, 3], sizes = [4, 1], strides = [1, 1]} : vector<4x4xf32> to vector<4x1xf32>
    %26 = vector.extract_strided_slice %7 {offsets = [3, 0], sizes = [1, 256], strides = [1, 1]} : vector<4x256xf32> to vector<1x256xf32>
    %27 = vector.broadcast %25 : vector<4x1xf32> to vector<4x256xf32>
    %28 = vector.broadcast %26 : vector<1x256xf32> to vector<4x256xf32>
    %29 = arith.mulf %27, %28 : vector<4x256xf32>
    %30 = arith.addf %24, %29 : vector<4x256xf32>
    %31 = vector.extract_strided_slice %3 {offsets = [4, 0], sizes = [4, 256], strides = [1, 1]} : vector<8x256xf32> to vector<4x256xf32>
    %32 = vector.extract_strided_slice %6 {offsets = [0, 0], sizes = [4, 1], strides = [1, 1]} : vector<4x4xf32> to vector<4x1xf32>
    %33 = vector.extract_strided_slice %31 {offsets = [0, 0], sizes = [1, 256], strides = [1, 1]} : vector<4x256xf32> to vector<1x256xf32>
    %34 = vector.broadcast %32 : vector<4x1xf32> to vector<4x256xf32>
    %35 = vector.broadcast %33 : vector<1x256xf32> to vector<4x256xf32>
    %36 = arith.mulf %34, %35 : vector<4x256xf32>
    %37 = vector.extract_strided_slice %6 {offsets = [0, 1], sizes = [4, 1], strides = [1, 1]} : vector<4x4xf32> to vector<4x1xf32>
    %38 = vector.extract_strided_slice %31 {offsets = [1, 0], sizes = [1, 256], strides = [1, 1]} : vector<4x256xf32> to vector<1x256xf32>
    %39 = vector.broadcast %37 : vector<4x1xf32> to vector<4x256xf32>
    %40 = vector.broadcast %38 : vector<1x256xf32> to vector<4x256xf32>
    %41 = arith.mulf %39, %40 : vector<4x256xf32>
    %42 = arith.addf %36, %41 : vector<4x256xf32>
    %43 = vector.extract_strided_slice %6 {offsets = [0, 2], sizes = [4, 1], strides = [1, 1]} : vector<4x4xf32> to vector<4x1xf32>
    %44 = vector.extract_strided_slice %31 {offsets = [2, 0], sizes = [1, 256], strides = [1, 1]} : vector<4x256xf32> to vector<1x256xf32>
    %45 = vector.broadcast %43 : vector<4x1xf32> to vector<4x256xf32>
    %46 = vector.broadcast %44 : vector<1x256xf32> to vector<4x256xf32>
    %47 = arith.mulf %45, %46 : vector<4x256xf32>
    %48 = arith.addf %42, %47 : vector<4x256xf32>
    %49 = vector.extract_strided_slice %6 {offsets = [0, 3], sizes = [4, 1], strides = [1, 1]} : vector<4x4xf32> to vector<4x1xf32>
    %50 = vector.extract_strided_slice %31 {offsets = [3, 0], sizes = [1, 256], strides = [1, 1]} : vector<4x256xf32> to vector<1x256xf32>
    %51 = vector.broadcast %49 : vector<4x1xf32> to vector<4x256xf32>
    %52 = vector.broadcast %50 : vector<1x256xf32> to vector<4x256xf32>
    %53 = arith.mulf %51, %52 : vector<4x256xf32>
    %54 = arith.addf %48, %53 : vector<4x256xf32>
    %55 = tpu.concatenate %30, %54 in 0 : vector<4x256xf32>, vector<4x256xf32> -> vector<8x256xf32>
    %56 = vector.broadcast %5 : vector<8x1xf32> to vector<8x256xf32>
    %57 = arith.addf %55, %56 : vector<8x256xf32>
    %c0_10 = arith.constant 0 : index
    %c0_11 = arith.constant 0 : index
    %c0_12 = arith.constant 0 : index
    %58 = vector.load %arg5[%c0_10, %c0_11, %c0_12] : memref<4x4x1xf32, #tpu.memory_space<vmem>>, vector<1x4x1xf32>
    %59 = vector.shape_cast %58 : vector<1x4x1xf32> to vector<4x1xf32>
    %c0_13 = arith.constant 0 : index
    %c0_14 = arith.constant 0 : index
    %c0_15 = arith.constant 0 : index
    %60 = vector.load %arg6[%c0_13, %c0_14, %c0_15] : memref<4x4x1xf32, #tpu.memory_space<vmem>>, vector<1x4x1xf32>
    %61 = vector.shape_cast %60 : vector<1x4x1xf32> to vector<4x1xf32>
    %cst = arith.constant dense<0.000000e+00> : vector<8xf32>
    %62 = vector.multi_reduction <add>, %57, %cst [1] : vector<8x256xf32> to vector<8xf32>
    %63 = vector.shape_cast %62 : vector<8xf32> to vector<8x1xf32>
    %64 = arith.mulf %57, %57 : vector<8x256xf32>
    %cst_16 = arith.constant dense<0.000000e+00> : vector<8xf32>
    %65 = vector.multi_reduction <add>, %64, %cst_16 [1] : vector<8x256xf32> to vector<8xf32>
    %66 = vector.shape_cast %65 : vector<8xf32> to vector<8x1xf32>
    %67 = vector.extract_strided_slice %63 {offsets = [0, 0], sizes = [4, 1], strides = [1, 1]} : vector<8x1xf32> to vector<4x1xf32>
    %68 = vector.extract_strided_slice %66 {offsets = [0, 0], sizes = [4, 1], strides = [1, 1]} : vector<8x1xf32> to vector<4x1xf32>
    %69 = vector.extract_strided_slice %63 {offsets = [4, 0], sizes = [4, 1], strides = [1, 1]} : vector<8x1xf32> to vector<4x1xf32>
    %70 = arith.addf %67, %69 : vector<4x1xf32>
    %71 = vector.extract_strided_slice %66 {offsets = [4, 0], sizes = [4, 1], strides = [1, 1]} : vector<8x1xf32> to vector<4x1xf32>
    %72 = arith.addf %68, %71 : vector<4x1xf32>
    %cst_17 = arith.constant 0.001953125 : f32
    %73 = vector.broadcast %cst_17 : f32 to vector<4x1xf32>
    %74 = arith.mulf %70, %73 : vector<4x1xf32>
    %cst_18 = arith.constant 0.001953125 : f32
    %75 = vector.broadcast %cst_18 : f32 to vector<4x1xf32>
    %76 = arith.mulf %72, %75 : vector<4x1xf32>
    %77 = arith.mulf %74, %74 : vector<4x1xf32>
    %78 = arith.subf %76, %77 : vector<4x1xf32>
    %cst_19 = arith.constant 0.000000e+00 : f32
    %79 = vector.broadcast %cst_19 : f32 to vector<4x1xf32>
    %80 = arith.maximumf %78, %79 : vector<4x1xf32>
    %cst_20 = arith.constant 9.99999974E-6 : f32
    %81 = vector.broadcast %cst_20 : f32 to vector<4x1xf32>
    %82 = arith.addf %80, %81 : vector<4x1xf32>
    %83 = math.rsqrt %82 : vector<4x1xf32>
    %84 = arith.mulf %83, %59 : vector<4x1xf32>
    %85 = arith.mulf %74, %84 : vector<4x1xf32>
    %86 = arith.subf %61, %85 : vector<4x1xf32>
    %87 = tpu.concatenate %84, %84 in 0 : vector<4x1xf32>, vector<4x1xf32> -> vector<8x1xf32>
    %88 = tpu.concatenate %86, %86 in 0 : vector<4x1xf32>, vector<4x1xf32> -> vector<8x1xf32>
    %89 = vector.broadcast %87 : vector<8x1xf32> to vector<8x256xf32>
    %90 = arith.mulf %57, %89 : vector<8x256xf32>
    %91 = vector.broadcast %88 : vector<8x1xf32> to vector<8x256xf32>
    %92 = arith.addf %90, %91 : vector<8x256xf32>
    %cst_21 = arith.constant 5.000000e-01 : f32
    %93 = vector.broadcast %cst_21 : f32 to vector<8x256xf32>
    %94 = arith.mulf %93, %92 : vector<8x256xf32>
    %cst_22 = arith.constant 0.707106769 : f32
    %95 = vector.broadcast %cst_22 : f32 to vector<8x256xf32>
    %96 = arith.mulf %92, %95 : vector<8x256xf32>
    %cst_23 = arith.constant 0.000000e+00 : f32
    %97 = vector.broadcast %cst_23 : f32 to vector<8x256xf32>
    %98 = arith.cmpf olt, %96, %97 : vector<8x256xf32>
    %cst_24 = arith.constant -1.000000e+00 : f32
    %cst_25 = arith.constant 1.000000e+00 : f32
    %99 = vector.broadcast %cst_24 : f32 to vector<8x256xf32>
    %100 = vector.broadcast %cst_25 : f32 to vector<8x256xf32>
    %101 = arith.select %98, %99, %100 : vector<8x256xi1>, vector<8x256xf32>
    %102 = math.absf %96 : vector<8x256xf32>
    %cst_26 = arith.constant 0.327591091 : f32
    %103 = vector.broadcast %cst_26 : f32 to vector<8x256xf32>
    %104 = arith.mulf %103, %102 : vector<8x256xf32>
    %cst_27 = arith.constant 1.000000e+00 : f32
    %105 = vector.broadcast %cst_27 : f32 to vector<8x256xf32>
    %106 = arith.addf %105, %104 : vector<8x256xf32>
    %107 = tpu.reciprocal %106 {approx = true} : vector<8x256xf32> -> vector<8x256xf32>
    %108 = arith.mulf %106, %107 : vector<8x256xf32>
    %cst_28 = arith.constant 2.000000e+00 : f32
    %109 = vector.broadcast %cst_28 : f32 to vector<8x256xf32>
    %110 = arith.subf %109, %108 : vector<8x256xf32>
    %111 = arith.mulf %107, %110 : vector<8x256xf32>
    %cst_29 = arith.constant 1.06140542 : f32
    %112 = vector.broadcast %cst_29 : f32 to vector<8x256xf32>
    %113 = arith.mulf %112, %111 : vector<8x256xf32>
    %cst_30 = arith.constant -1.45315206 : f32
    %114 = vector.broadcast %cst_30 : f32 to vector<8x256xf32>
    %115 = arith.addf %113, %114 : vector<8x256xf32>
    %116 = arith.mulf %115, %111 : vector<8x256xf32>
    %cst_31 = arith.constant 1.42141378 : f32
    %117 = vector.broadcast %cst_31 : f32 to vector<8x256xf32>
    %118 = arith.addf %116, %117 : vector<8x256xf32>
    %119 = arith.mulf %118, %111 : vector<8x256xf32>
    %cst_32 = arith.constant -0.284496725 : f32
    %120 = vector.broadcast %cst_32 : f32 to vector<8x256xf32>
    %121 = arith.addf %119, %120 : vector<8x256xf32>
    %122 = arith.mulf %121, %111 : vector<8x256xf32>
    %cst_33 = arith.constant 0.254829586 : f32
    %123 = vector.broadcast %cst_33 : f32 to vector<8x256xf32>
    %124 = arith.addf %122, %123 : vector<8x256xf32>
    %125 = arith.mulf %124, %111 : vector<8x256xf32>
    %cst_34 = arith.constant 0.000000e+00 : f32
    %126 = vector.broadcast %cst_34 : f32 to vector<8x256xf32>
    %127 = arith.subf %126, %102 : vector<8x256xf32>
    %128 = arith.mulf %127, %102 : vector<8x256xf32>
    %129 = math.exp %128 : vector<8x256xf32>
    %130 = arith.mulf %125, %129 : vector<8x256xf32>
    %cst_35 = arith.constant 1.000000e+00 : f32
    %131 = vector.broadcast %cst_35 : f32 to vector<8x256xf32>
    %132 = arith.subf %131, %130 : vector<8x256xf32>
    %133 = arith.mulf %101, %132 : vector<8x256xf32>
    %cst_36 = arith.constant 1.000000e+00 : f32
    %134 = vector.broadcast %cst_36 : f32 to vector<8x256xf32>
    %135 = arith.addf %134, %133 : vector<8x256xf32>
    %136 = arith.mulf %94, %135 : vector<8x256xf32>
    %c0_37 = arith.constant 0 : index
    %c0_38 = arith.constant 0 : index
    %c0_39 = arith.constant 0 : index
    %137 = vector.load %arg8[%c0_37, %c0_38, %c0_39] : memref<4x8x256xf32, #tpu.memory_space<vmem>>, vector<1x8x256xf32>
    %138 = vector.shape_cast %137 : vector<1x8x256xf32> to vector<8x256xf32>
    %139 = vector.shape_cast %136 : vector<8x256xf32> to vector<1x8x256xf32>
    tpu.vector_store %arg8[%c0_37, %c0_38, %c0_39], %139 {strides = array<i32>} : memref<4x8x256xf32, #tpu.memory_space<vmem>>, vector<1x8x256xf32>,
    %c1_40 = arith.constant 1 : index
    %c0_41 = arith.constant 0 : index
    %c0_42 = arith.constant 0 : index
    %140 = vector.load %arg1[%c1_40, %c0_41, %c0_42] : memref<4x8x256xf32, #tpu.memory_space<vmem>>, vector<1x8x256xf32>
    %141 = vector.shape_cast %140 : vector<1x8x256xf32> to vector<8x256xf32>
    %c1_43 = arith.constant 1 : index
    %c0_44 = arith.constant 0 : index
    %c0_45 = arith.constant 0 : index
    %142 = vector.load %arg3[%c1_43, %c0_44, %c0_45] : memref<4x8x9xf32, #tpu.memory_space<vmem>>, vector<1x8x9xf32>
    %143 = vector.shape_cast %142 : vector<1x8x9xf32> to vector<8x9xf32>
    %c1_46 = arith.constant 1 : index
    %c0_47 = arith.constant 0 : index
    %c0_48 = arith.constant 0 : index
    %144 = vector.load %arg4[%c1_46, %c0_47, %c0_48] : memref<4x8x1xf32, #tpu.memory_space<vmem>>, vector<1x8x1xf32>
    %145 = vector.shape_cast %144 : vector<1x8x1xf32> to vector<8x1xf32>
    %c16_i32 = arith.constant 16 : i32
    %146 = tpu.dynamic_rotate %141 by %c16_i32 dim 1 : vector<8x256xf32>, i32 -> vector<8x256xf32>
    %c1_i32 = arith.constant 1 : i32
    %147 = vector.broadcast %c1_i32 : i32 to vector<1x256xi32>
    %148 = arith.cmpi sge, %0, %147 : vector<1x256xi32>
    %cst_49 = arith.constant 0.000000e+00 : f32
    %149 = vector.shape_cast %148 : vector<1x256xi1> to vector<1x256xi1>
    %150 = vector.broadcast %149 : vector<1x256xi1> to vector<8x256xi1>
    %151 = vector.broadcast %cst_49 : f32 to vector<8x256xf32>
    %152 = arith.select %150, %146, %151 : vector<8x256xi1>, vector<8x256xf32>
    %c1_i32_50 = arith.constant 1 : i32
    %153 = tpu.dynamic_rotate %152 by %c1_i32_50 dim 1 : vector<8x256xf32>, i32 -> vector<8x256xf32>
    %c1_i32_51 = arith.constant 1 : i32
    %154 = vector.broadcast %c1_i32_51 : i32 to vector<1x256xi32>
    %155 = arith.cmpi sge, %1, %154 : vector<1x256xi32>
    %cst_52 = arith.constant 0.000000e+00 : f32
    %156 = vector.shape_cast %155 : vector<1x256xi1> to vector<1x256xi1>
    %157 = vector.broadcast %156 : vector<1x256xi1> to vector<8x256xi1>
    %158 = vector.broadcast %cst_52 : f32 to vector<8x256xf32>
    %159 = arith.select %157, %153, %158 : vector<8x256xi1>, vector<8x256xf32>
    %160 = vector.extract_strided_slice %143 {offsets = [0, 0], sizes = [8, 1], strides = [1, 1]} : vector<8x9xf32> to vector<8x1xf32>
    %161 = vector.broadcast %160 : vector<8x1xf32> to vector<8x256xf32>
    %162 = arith.mulf %161, %159 : vector<8x256xf32>
    %163 = vector.extract_strided_slice %143 {offsets = [0, 1], sizes = [8, 1], strides = [1, 1]} : vector<8x9xf32> to vector<8x1xf32>
    %164 = vector.broadcast %163 : vector<8x1xf32> to vector<8x256xf32>
    %165 = arith.mulf %164, %152 : vector<8x256xf32>
    %166 = arith.addf %162, %165 : vector<8x256xf32>
    %c255_i32 = arith.constant 255 : i32
    %167 = tpu.dynamic_rotate %152 by %c255_i32 dim 1 : vector<8x256xf32>, i32 -> vector<8x256xf32>
    %c15_i32 = arith.constant 15 : i32
    %168 = vector.broadcast %c15_i32 : i32 to vector<1x256xi32>
    %169 = arith.cmpi slt, %1, %168 : vector<1x256xi32>
    %cst_53 = arith.constant 0.000000e+00 : f32
    %170 = vector.shape_cast %169 : vector<1x256xi1> to vector<1x256xi1>
    %171 = vector.broadcast %170 : vector<1x256xi1> to vector<8x256xi1>
    %172 = vector.broadcast %cst_53 : f32 to vector<8x256xf32>
    %173 = arith.select %171, %167, %172 : vector<8x256xi1>, vector<8x256xf32>
    %174 = vector.extract_strided_slice %143 {offsets = [0, 2], sizes = [8, 1], strides = [1, 1]} : vector<8x9xf32> to vector<8x1xf32>
    %175 = vector.broadcast %174 : vector<8x1xf32> to vector<8x256xf32>
    %176 = arith.mulf %175, %173 : vector<8x256xf32>
    %177 = arith.addf %166, %176 : vector<8x256xf32>
    %c1_i32_54 = arith.constant 1 : i32
    %178 = tpu.dynamic_rotate %141 by %c1_i32_54 dim 1 : vector<8x256xf32>, i32 -> vector<8x256xf32>
    %c1_i32_55 = arith.constant 1 : i32
    %179 = vector.broadcast %c1_i32_55 : i32 to vector<1x256xi32>
    %180 = arith.cmpi sge, %1, %179 : vector<1x256xi32>
    %cst_56 = arith.constant 0.000000e+00 : f32
    %181 = vector.shape_cast %180 : vector<1x256xi1> to vector<1x256xi1>
    %182 = vector.broadcast %181 : vector<1x256xi1> to vector<8x256xi1>
    %183 = vector.broadcast %cst_56 : f32 to vector<8x256xf32>
    %184 = arith.select %182, %178, %183 : vector<8x256xi1>, vector<8x256xf32>
    %185 = vector.extract_strided_slice %143 {offsets = [0, 3], sizes = [8, 1], strides = [1, 1]} : vector<8x9xf32> to vector<8x1xf32>
    %186 = vector.broadcast %185 : vector<8x1xf32> to vector<8x256xf32>
    %187 = arith.mulf %186, %184 : vector<8x256xf32>
    %188 = vector.extract_strided_slice %143 {offsets = [0, 4], sizes = [8, 1], strides = [1, 1]} : vector<8x9xf32> to vector<8x1xf32>
    %189 = vector.broadcast %188 : vector<8x1xf32> to vector<8x256xf32>
    %190 = arith.mulf %189, %141 : vector<8x256xf32>
    %191 = arith.addf %187, %190 : vector<8x256xf32>
    %c255_i32_57 = arith.constant 255 : i32
    %192 = tpu.dynamic_rotate %141 by %c255_i32_57 dim 1 : vector<8x256xf32>, i32 -> vector<8x256xf32>
    %c15_i32_58 = arith.constant 15 : i32
    %193 = vector.broadcast %c15_i32_58 : i32 to vector<1x256xi32>
    %194 = arith.cmpi slt, %1, %193 : vector<1x256xi32>
    %cst_59 = arith.constant 0.000000e+00 : f32
    %195 = vector.shape_cast %194 : vector<1x256xi1> to vector<1x256xi1>
    %196 = vector.broadcast %195 : vector<1x256xi1> to vector<8x256xi1>
    %197 = vector.broadcast %cst_59 : f32 to vector<8x256xf32>
    %198 = arith.select %196, %192, %197 : vector<8x256xi1>, vector<8x256xf32>
    %199 = vector.extract_strided_slice %143 {offsets = [0, 5], sizes = [8, 1], strides = [1, 1]} : vector<8x9xf32> to vector<8x1xf32>
    %200 = vector.broadcast %199 : vector<8x1xf32> to vector<8x256xf32>
    %201 = arith.mulf %200, %198 : vector<8x256xf32>
    %202 = arith.addf %191, %201 : vector<8x256xf32>
    %c240_i32 = arith.constant 240 : i32
    %203 = tpu.dynamic_rotate %141 by %c240_i32 dim 1 : vector<8x256xf32>, i32 -> vector<8x256xf32>
    %c15_i32_60 = arith.constant 15 : i32
    %204 = vector.broadcast %c15_i32_60 : i32 to vector<1x256xi32>
    %205 = arith.cmpi slt, %0, %204 : vector<1x256xi32>
    %cst_61 = arith.constant 0.000000e+00 : f32
    %206 = vector.shape_cast %205 : vector<1x256xi1> to vector<1x256xi1>
    %207 = vector.broadcast %206 : vector<1x256xi1> to vector<8x256xi1>
    %208 = vector.broadcast %cst_61 : f32 to vector<8x256xf32>
    %209 = arith.select %207, %203, %208 : vector<8x256xi1>, vector<8x256xf32>
    %c1_i32_62 = arith.constant 1 : i32
    %210 = tpu.dynamic_rotate %209 by %c1_i32_62 dim 1 : vector<8x256xf32>, i32 -> vector<8x256xf32>
    %c1_i32_63 = arith.constant 1 : i32
    %211 = vector.broadcast %c1_i32_63 : i32 to vector<1x256xi32>
    %212 = arith.cmpi sge, %1, %211 : vector<1x256xi32>
    %cst_64 = arith.constant 0.000000e+00 : f32
    %213 = vector.shape_cast %212 : vector<1x256xi1> to vector<1x256xi1>
    %214 = vector.broadcast %213 : vector<1x256xi1> to vector<8x256xi1>
    %215 = vector.broadcast %cst_64 : f32 to vector<8x256xf32>
    %216 = arith.select %214, %210, %215 : vector<8x256xi1>, vector<8x256xf32>
    %217 = vector.extract_strided_slice %143 {offsets = [0, 6], sizes = [8, 1], strides = [1, 1]} : vector<8x9xf32> to vector<8x1xf32>
    %218 = vector.broadcast %217 : vector<8x1xf32> to vector<8x256xf32>
    %219 = arith.mulf %218, %216 : vector<8x256xf32>
    %220 = vector.extract_strided_slice %143 {offsets = [0, 7], sizes = [8, 1], strides = [1, 1]} : vector<8x9xf32> to vector<8x1xf32>
    %221 = vector.broadcast %220 : vector<8x1xf32> to vector<8x256xf32>
    %222 = arith.mulf %221, %209 : vector<8x256xf32>
    %223 = arith.addf %219, %222 : vector<8x256xf32>
    %c255_i32_65 = arith.constant 255 : i32
    %224 = tpu.dynamic_rotate %209 by %c255_i32_65 dim 1 : vector<8x256xf32>, i32 -> vector<8x256xf32>
    %c15_i32_66 = arith.constant 15 : i32
    %225 = vector.broadcast %c15_i32_66 : i32 to vector<1x256xi32>
    %226 = arith.cmpi slt, %1, %225 : vector<1x256xi32>
    %cst_67 = arith.constant 0.000000e+00 : f32
    %227 = vector.shape_cast %226 : vector<1x256xi1> to vector<1x256xi1>
    %228 = vector.broadcast %227 : vector<1x256xi1> to vector<8x256xi1>
    %229 = vector.broadcast %cst_67 : f32 to vector<8x256xf32>
    %230 = arith.select %228, %224, %229 : vector<8x256xi1>, vector<8x256xf32>
    %231 = vector.extract_strided_slice %143 {offsets = [0, 8], sizes = [8, 1], strides = [1, 1]} : vector<8x9xf32> to vector<8x1xf32>
    %232 = vector.broadcast %231 : vector<8x1xf32> to vector<8x256xf32>
    %233 = arith.mulf %232, %230 : vector<8x256xf32>
    %234 = arith.addf %223, %233 : vector<8x256xf32>
    %235 = arith.addf %177, %202 : vector<8x256xf32>
    %236 = vector.broadcast %145 : vector<8x1xf32> to vector<8x256xf32>
    %237 = arith.addf %234, %236 : vector<8x256xf32>
    %238 = arith.addf %235, %237 : vector<8x256xf32>
    %c1_68 = arith.constant 1 : index
    %c0_69 = arith.constant 0 : index
    %c0_70 = arith.constant 0 : index
    %239 = vector.load %arg5[%c1_68, %c0_69, %c0_70] : memref<4x4x1xf32, #tpu.memory_space<vmem>>, vector<1x4x1xf32>
    %240 = vector.shape_cast %239 : vector<1x4x1xf32> to vector<4x1xf32>
    %c1_71 = arith.constant 1 : index
    %c0_72 = arith.constant 0 : index
    %c0_73 = arith.constant 0 : index
    %241 = vector.load %arg6[%c1_71, %c0_72, %c0_73] : memref<4x4x1xf32, #tpu.memory_space<vmem>>, vector<1x4x1xf32>
    %242 = vector.shape_cast %241 : vector<1x4x1xf32> to vector<4x1xf32>
    %cst_74 = arith.constant dense<0.000000e+00> : vector<8xf32>
    %243 = vector.multi_reduction <add>, %238, %cst_74 [1] : vector<8x256xf32> to vector<8xf32>
    %244 = vector.shape_cast %243 : vector<8xf32> to vector<8x1xf32>
    %245 = arith.mulf %238, %238 : vector<8x256xf32>
    %cst_75 = arith.constant dense<0.000000e+00> : vector<8xf32>
    %246 = vector.multi_reduction <add>, %245, %cst_75 [1] : vector<8x256xf32> to vector<8xf32>
    %247 = vector.shape_cast %246 : vector<8xf32> to vector<8x1xf32>
    %248 = vector.extract_strided_slice %244 {offsets = [0, 0], sizes = [4, 1], strides = [1, 1]} : vector<8x1xf32> to vector<4x1xf32>
    %249 = vector.extract_strided_slice %247 {offsets = [0, 0], sizes = [4, 1], strides = [1, 1]} : vector<8x1xf32> to vector<4x1xf32>
    %250 = vector.extract_strided_slice %244 {offsets = [4, 0], sizes = [4, 1], strides = [1, 1]} : vector<8x1xf32> to vector<4x1xf32>
    %251 = arith.addf %248, %250 : vector<4x1xf32>
    %252 = vector.extract_strided_slice %247 {offsets = [4, 0], sizes = [4, 1], strides = [1, 1]} : vector<8x1xf32> to vector<4x1xf32>
    %253 = arith.addf %249, %252 : vector<4x1xf32>
    %cst_76 = arith.constant 0.001953125 : f32
    %254 = vector.broadcast %cst_76 : f32 to vector<4x1xf32>
    %255 = arith.mulf %251, %254 : vector<4x1xf32>
    %cst_77 = arith.constant 0.001953125 : f32
    %256 = vector.broadcast %cst_77 : f32 to vector<4x1xf32>
    %257 = arith.mulf %253, %256 : vector<4x1xf32>
    %258 = arith.mulf %255, %255 : vector<4x1xf32>
    %259 = arith.subf %257, %258 : vector<4x1xf32>
    %cst_78 = arith.constant 0.000000e+00 : f32
    %260 = vector.broadcast %cst_78 : f32 to vector<4x1xf32>
    %261 = arith.maximumf %259, %260 : vector<4x1xf32>
    %cst_79 = arith.constant 9.99999974E-6 : f32
    %262 = vector.broadcast %cst_79 : f32 to vector<4x1xf32>
    %263 = arith.addf %261, %262 : vector<4x1xf32>
    %264 = math.rsqrt %263 : vector<4x1xf32>
    %265 = arith.mulf %264, %240 : vector<4x1xf32>
    %266 = arith.mulf %255, %265 : vector<4x1xf32>
    %267 = arith.subf %242, %266 : vector<4x1xf32>
    %268 = tpu.concatenate %265, %265 in 0 : vector<4x1xf32>, vector<4x1xf32> -> vector<8x1xf32>
    %269 = tpu.concatenate %267, %267 in 0 : vector<4x1xf32>, vector<4x1xf32> -> vector<8x1xf32>
    %270 = vector.broadcast %268 : vector<8x1xf32> to vector<8x256xf32>
    %271 = arith.mulf %238, %270 : vector<8x256xf32>
    %272 = vector.broadcast %269 : vector<8x1xf32> to vector<8x256xf32>
    %273 = arith.addf %271, %272 : vector<8x256xf32>
    %cst_80 = arith.constant 5.000000e-01 : f32
    %274 = vector.broadcast %cst_80 : f32 to vector<8x256xf32>
    %275 = arith.mulf %274, %273 : vector<8x256xf32>
    %cst_81 = arith.constant 0.707106769 : f32
    %276 = vector.broadcast %cst_81 : f32 to vector<8x256xf32>
    %277 = arith.mulf %273, %276 : vector<8x256xf32>
    %cst_82 = arith.constant 0.000000e+00 : f32
    %278 = vector.broadcast %cst_82 : f32 to vector<8x256xf32>
    %279 = arith.cmpf olt, %277, %278 : vector<8x256xf32>
    %cst_83 = arith.constant -1.000000e+00 : f32
    %cst_84 = arith.constant 1.000000e+00 : f32
    %280 = vector.broadcast %cst_83 : f32 to vector<8x256xf32>
    %281 = vector.broadcast %cst_84 : f32 to vector<8x256xf32>
    %282 = arith.select %279, %280, %281 : vector<8x256xi1>, vector<8x256xf32>
    %283 = math.absf %277 : vector<8x256xf32>
    %cst_85 = arith.constant 0.327591091 : f32
    %284 = vector.broadcast %cst_85 : f32 to vector<8x256xf32>
    %285 = arith.mulf %284, %283 : vector<8x256xf32>
    %cst_86 = arith.constant 1.000000e+00 : f32
    %286 = vector.broadcast %cst_86 : f32 to vector<8x256xf32>
    %287 = arith.addf %286, %285 : vector<8x256xf32>
    %288 = tpu.reciprocal %287 {approx = true} : vector<8x256xf32> -> vector<8x256xf32>
    %289 = arith.mulf %287, %288 : vector<8x256xf32>
    %cst_87 = arith.constant 2.000000e+00 : f32
    %290 = vector.broadcast %cst_87 : f32 to vector<8x256xf32>
    %291 = arith.subf %290, %289 : vector<8x256xf32>
    %292 = arith.mulf %288, %291 : vector<8x256xf32>
    %cst_88 = arith.constant 1.06140542 : f32
    %293 = vector.broadcast %cst_88 : f32 to vector<8x256xf32>
    %294 = arith.mulf %293, %292 : vector<8x256xf32>
    %cst_89 = arith.constant -1.45315206 : f32
    %295 = vector.broadcast %cst_89 : f32 to vector<8x256xf32>
    %296 = arith.addf %294, %295 : vector<8x256xf32>
    %297 = arith.mulf %296, %292 : vector<8x256xf32>
    %cst_90 = arith.constant 1.42141378 : f32
    %298 = vector.broadcast %cst_90 : f32 to vector<8x256xf32>
    %299 = arith.addf %297, %298 : vector<8x256xf32>
    %300 = arith.mulf %299, %292 : vector<8x256xf32>
    %cst_91 = arith.constant -0.284496725 : f32
    %301 = vector.broadcast %cst_91 : f32 to vector<8x256xf32>
    %302 = arith.addf %300, %301 : vector<8x256xf32>
    %303 = arith.mulf %302, %292 : vector<8x256xf32>
    %cst_92 = arith.constant 0.254829586 : f32
    %304 = vector.broadcast %cst_92 : f32 to vector<8x256xf32>
    %305 = arith.addf %303, %304 : vector<8x256xf32>
    %306 = arith.mulf %305, %292 : vector<8x256xf32>
    %cst_93 = arith.constant 0.000000e+00 : f32
    %307 = vector.broadcast %cst_93 : f32 to vector<8x256xf32>
    %308 = arith.subf %307, %283 : vector<8x256xf32>
    %309 = arith.mulf %308, %283 : vector<8x256xf32>
    %310 = math.exp %309 : vector<8x256xf32>
    %311 = arith.mulf %306, %310 : vector<8x256xf32>
    %cst_94 = arith.constant 1.000000e+00 : f32
    %312 = vector.broadcast %cst_94 : f32 to vector<8x256xf32>
    %313 = arith.subf %312, %311 : vector<8x256xf32>
    %314 = arith.mulf %282, %313 : vector<8x256xf32>
    %cst_95 = arith.constant 1.000000e+00 : f32
    %315 = vector.broadcast %cst_95 : f32 to vector<8x256xf32>
    %316 = arith.addf %315, %314 : vector<8x256xf32>
    %317 = arith.mulf %275, %316 : vector<8x256xf32>
    %c1_96 = arith.constant 1 : index
    %c0_97 = arith.constant 0 : index
    %c0_98 = arith.constant 0 : index
    %318 = vector.load %arg8[%c1_96, %c0_97, %c0_98] : memref<4x8x256xf32, #tpu.memory_space<vmem>>, vector<1x8x256xf32>
    %319 = vector.shape_cast %318 : vector<1x8x256xf32> to vector<8x256xf32>
    %320 = vector.shape_cast %317 : vector<8x256xf32> to vector<1x8x256xf32>
    tpu.vector_store %arg8[%c1_96, %c0_97, %c0_98], %320 {strides = array<i32>} : memref<4x8x256xf32, #tpu.memory_space<vmem>>, vector<1x8x256xf32>,
    %c2 = arith.constant 2 : index
    %c0_99 = arith.constant 0 : index
    %c0_100 = arith.constant 0 : index
    %321 = vector.load %arg1[%c2, %c0_99, %c0_100] : memref<4x8x256xf32, #tpu.memory_space<vmem>>, vector<1x8x256xf32>
    %322 = vector.shape_cast %321 : vector<1x8x256xf32> to vector<8x256xf32>
    %c2_101 = arith.constant 2 : index
    %c0_102 = arith.constant 0 : index
    %c0_103 = arith.constant 0 : index
    %323 = vector.load %arg3[%c2_101, %c0_102, %c0_103] : memref<4x8x9xf32, #tpu.memory_space<vmem>>, vector<1x8x9xf32>
    %324 = vector.shape_cast %323 : vector<1x8x9xf32> to vector<8x9xf32>
    %c2_104 = arith.constant 2 : index
    %c0_105 = arith.constant 0 : index
    %c0_106 = arith.constant 0 : index
    %325 = vector.load %arg4[%c2_104, %c0_105, %c0_106] : memref<4x8x1xf32, #tpu.memory_space<vmem>>, vector<1x8x1xf32>
    %326 = vector.shape_cast %325 : vector<1x8x1xf32> to vector<8x1xf32>
    %c32_i32 = arith.constant 32 : i32
    %327 = tpu.dynamic_rotate %322 by %c32_i32 dim 1 : vector<8x256xf32>, i32 -> vector<8x256xf32>
    %c2_i32 = arith.constant 2 : i32
    %328 = vector.broadcast %c2_i32 : i32 to vector<1x256xi32>
    %329 = arith.cmpi sge, %0, %328 : vector<1x256xi32>
    %cst_107 = arith.constant 0.000000e+00 : f32
    %330 = vector.shape_cast %329 : vector<1x256xi1> to vector<1x256xi1>
    %331 = vector.broadcast %330 : vector<1x256xi1> to vector<8x256xi1>
    %332 = vector.broadcast %cst_107 : f32 to vector<8x256xf32>
    %333 = arith.select %331, %327, %332 : vector<8x256xi1>, vector<8x256xf32>
    %c2_i32_108 = arith.constant 2 : i32
    %334 = tpu.dynamic_rotate %333 by %c2_i32_108 dim 1 : vector<8x256xf32>, i32 -> vector<8x256xf32>
    %c2_i32_109 = arith.constant 2 : i32
    %335 = vector.broadcast %c2_i32_109 : i32 to vector<1x256xi32>
    %336 = arith.cmpi sge, %1, %335 : vector<1x256xi32>
    %cst_110 = arith.constant 0.000000e+00 : f32
    %337 = vector.shape_cast %336 : vector<1x256xi1> to vector<1x256xi1>
    %338 = vector.broadcast %337 : vector<1x256xi1> to vector<8x256xi1>
    %339 = vector.broadcast %cst_110 : f32 to vector<8x256xf32>
    %340 = arith.select %338, %334, %339 : vector<8x256xi1>, vector<8x256xf32>
    %341 = vector.extract_strided_slice %324 {offsets = [0, 0], sizes = [8, 1], strides = [1, 1]} : vector<8x9xf32> to vector<8x1xf32>
    %342 = vector.broadcast %341 : vector<8x1xf32> to vector<8x256xf32>
    %343 = arith.mulf %342, %340 : vector<8x256xf32>
    %344 = vector.extract_strided_slice %324 {offsets = [0, 1], sizes = [8, 1], strides = [1, 1]} : vector<8x9xf32> to vector<8x1xf32>
    %345 = vector.broadcast %344 : vector<8x1xf32> to vector<8x256xf32>
    %346 = arith.mulf %345, %333 : vector<8x256xf32>
    %347 = arith.addf %343, %346 : vector<8x256xf32>
    %c254_i32 = arith.constant 254 : i32
    %348 = tpu.dynamic_rotate %333 by %c254_i32 dim 1 : vector<8x256xf32>, i32 -> vector<8x256xf32>
    %c14_i32 = arith.constant 14 : i32
    %349 = vector.broadcast %c14_i32 : i32 to vector<1x256xi32>
    %350 = arith.cmpi slt, %1, %349 : vector<1x256xi32>
    %cst_111 = arith.constant 0.000000e+00 : f32
    %351 = vector.shape_cast %350 : vector<1x256xi1> to vector<1x256xi1>
    %352 = vector.broadcast %351 : vector<1x256xi1> to vector<8x256xi1>
    %353 = vector.broadcast %cst_111 : f32 to vector<8x256xf32>
    %354 = arith.select %352, %348, %353 : vector<8x256xi1>, vector<8x256xf32>
    %355 = vector.extract_strided_slice %324 {offsets = [0, 2], sizes = [8, 1], strides = [1, 1]} : vector<8x9xf32> to vector<8x1xf32>
    %356 = vector.broadcast %355 : vector<8x1xf32> to vector<8x256xf32>
    %357 = arith.mulf %356, %354 : vector<8x256xf32>
    %358 = arith.addf %347, %357 : vector<8x256xf32>
    %c2_i32_112 = arith.constant 2 : i32
    %359 = tpu.dynamic_rotate %322 by %c2_i32_112 dim 1 : vector<8x256xf32>, i32 -> vector<8x256xf32>
    %c2_i32_113 = arith.constant 2 : i32
    %360 = vector.broadcast %c2_i32_113 : i32 to vector<1x256xi32>
    %361 = arith.cmpi sge, %1, %360 : vector<1x256xi32>
    %cst_114 = arith.constant 0.000000e+00 : f32
    %362 = vector.shape_cast %361 : vector<1x256xi1> to vector<1x256xi1>
    %363 = vector.broadcast %362 : vector<1x256xi1> to vector<8x256xi1>
    %364 = vector.broadcast %cst_114 : f32 to vector<8x256xf32>
    %365 = arith.select %363, %359, %364 : vector<8x256xi1>, vector<8x256xf32>
    %366 = vector.extract_strided_slice %324 {offsets = [0, 3], sizes = [8, 1], strides = [1, 1]} : vector<8x9xf32> to vector<8x1xf32>
    %367 = vector.broadcast %366 : vector<8x1xf32> to vector<8x256xf32>
    %368 = arith.mulf %367, %365 : vector<8x256xf32>
    %369 = vector.extract_strided_slice %324 {offsets = [0, 4], sizes = [8, 1], strides = [1, 1]} : vector<8x9xf32> to vector<8x1xf32>
    %370 = vector.broadcast %369 : vector<8x1xf32> to vector<8x256xf32>
    %371 = arith.mulf %370, %322 : vector<8x256xf32>
    %372 = arith.addf %368, %371 : vector<8x256xf32>
    %c254_i32_115 = arith.constant 254 : i32
    %373 = tpu.dynamic_rotate %322 by %c254_i32_115 dim 1 : vector<8x256xf32>, i32 -> vector<8x256xf32>
    %c14_i32_116 = arith.constant 14 : i32
    %374 = vector.broadcast %c14_i32_116 : i32 to vector<1x256xi32>
    %375 = arith.cmpi slt, %1, %374 : vector<1x256xi32>
    %cst_117 = arith.constant 0.000000e+00 : f32
    %376 = vector.shape_cast %375 : vector<1x256xi1> to vector<1x256xi1>
    %377 = vector.broadcast %376 : vector<1x256xi1> to vector<8x256xi1>
    %378 = vector.broadcast %cst_117 : f32 to vector<8x256xf32>
    %379 = arith.select %377, %373, %378 : vector<8x256xi1>, vector<8x256xf32>
    %380 = vector.extract_strided_slice %324 {offsets = [0, 5], sizes = [8, 1], strides = [1, 1]} : vector<8x9xf32> to vector<8x1xf32>
    %381 = vector.broadcast %380 : vector<8x1xf32> to vector<8x256xf32>
    %382 = arith.mulf %381, %379 : vector<8x256xf32>
    %383 = arith.addf %372, %382 : vector<8x256xf32>
    %c224_i32 = arith.constant 224 : i32
    %384 = tpu.dynamic_rotate %322 by %c224_i32 dim 1 : vector<8x256xf32>, i32 -> vector<8x256xf32>
    %c14_i32_118 = arith.constant 14 : i32
    %385 = vector.broadcast %c14_i32_118 : i32 to vector<1x256xi32>
    %386 = arith.cmpi slt, %0, %385 : vector<1x256xi32>
    %cst_119 = arith.constant 0.000000e+00 : f32
    %387 = vector.shape_cast %386 : vector<1x256xi1> to vector<1x256xi1>
    %388 = vector.broadcast %387 : vector<1x256xi1> to vector<8x256xi1>
    %389 = vector.broadcast %cst_119 : f32 to vector<8x256xf32>
    %390 = arith.select %388, %384, %389 : vector<8x256xi1>, vector<8x256xf32>
    %c2_i32_120 = arith.constant 2 : i32
    %391 = tpu.dynamic_rotate %390 by %c2_i32_120 dim 1 : vector<8x256xf32>, i32 -> vector<8x256xf32>
    %c2_i32_121 = arith.constant 2 : i32
    %392 = vector.broadcast %c2_i32_121 : i32 to vector<1x256xi32>
    %393 = arith.cmpi sge, %1, %392 : vector<1x256xi32>
    %cst_122 = arith.constant 0.000000e+00 : f32
    %394 = vector.shape_cast %393 : vector<1x256xi1> to vector<1x256xi1>
    %395 = vector.broadcast %394 : vector<1x256xi1> to vector<8x256xi1>
    %396 = vector.broadcast %cst_122 : f32 to vector<8x256xf32>
    %397 = arith.select %395, %391, %396 : vector<8x256xi1>, vector<8x256xf32>
    %398 = vector.extract_strided_slice %324 {offsets = [0, 6], sizes = [8, 1], strides = [1, 1]} : vector<8x9xf32> to vector<8x1xf32>
    %399 = vector.broadcast %398 : vector<8x1xf32> to vector<8x256xf32>
    %400 = arith.mulf %399, %397 : vector<8x256xf32>
    %401 = vector.extract_strided_slice %324 {offsets = [0, 7], sizes = [8, 1], strides = [1, 1]} : vector<8x9xf32> to vector<8x1xf32>
    %402 = vector.broadcast %401 : vector<8x1xf32> to vector<8x256xf32>
    %403 = arith.mulf %402, %390 : vector<8x256xf32>
    %404 = arith.addf %400, %403 : vector<8x256xf32>
    %c254_i32_123 = arith.constant 254 : i32
    %405 = tpu.dynamic_rotate %390 by %c254_i32_123 dim 1 : vector<8x256xf32>, i32 -> vector<8x256xf32>
    %c14_i32_124 = arith.constant 14 : i32
    %406 = vector.broadcast %c14_i32_124 : i32 to vector<1x256xi32>
    %407 = arith.cmpi slt, %1, %406 : vector<1x256xi32>
    %cst_125 = arith.constant 0.000000e+00 : f32
    %408 = vector.shape_cast %407 : vector<1x256xi1> to vector<1x256xi1>
    %409 = vector.broadcast %408 : vector<1x256xi1> to vector<8x256xi1>
    %410 = vector.broadcast %cst_125 : f32 to vector<8x256xf32>
    %411 = arith.select %409, %405, %410 : vector<8x256xi1>, vector<8x256xf32>
    %412 = vector.extract_strided_slice %324 {offsets = [0, 8], sizes = [8, 1], strides = [1, 1]} : vector<8x9xf32> to vector<8x1xf32>
    %413 = vector.broadcast %412 : vector<8x1xf32> to vector<8x256xf32>
    %414 = arith.mulf %413, %411 : vector<8x256xf32>
    %415 = arith.addf %404, %414 : vector<8x256xf32>
    %416 = arith.addf %358, %383 : vector<8x256xf32>
    %417 = vector.broadcast %326 : vector<8x1xf32> to vector<8x256xf32>
    %418 = arith.addf %415, %417 : vector<8x256xf32>
    %419 = arith.addf %416, %418 : vector<8x256xf32>
    %c2_126 = arith.constant 2 : index
    %c0_127 = arith.constant 0 : index
    %c0_128 = arith.constant 0 : index
    %420 = vector.load %arg5[%c2_126, %c0_127, %c0_128] : memref<4x4x1xf32, #tpu.memory_space<vmem>>, vector<1x4x1xf32>
    %421 = vector.shape_cast %420 : vector<1x4x1xf32> to vector<4x1xf32>
    %c2_129 = arith.constant 2 : index
    %c0_130 = arith.constant 0 : index
    %c0_131 = arith.constant 0 : index
    %422 = vector.load %arg6[%c2_129, %c0_130, %c0_131] : memref<4x4x1xf32, #tpu.memory_space<vmem>>, vector<1x4x1xf32>
    %423 = vector.shape_cast %422 : vector<1x4x1xf32> to vector<4x1xf32>
    %cst_132 = arith.constant dense<0.000000e+00> : vector<8xf32>
    %424 = vector.multi_reduction <add>, %419, %cst_132 [1] : vector<8x256xf32> to vector<8xf32>
    %425 = vector.shape_cast %424 : vector<8xf32> to vector<8x1xf32>
    %426 = arith.mulf %419, %419 : vector<8x256xf32>
    %cst_133 = arith.constant dense<0.000000e+00> : vector<8xf32>
    %427 = vector.multi_reduction <add>, %426, %cst_133 [1] : vector<8x256xf32> to vector<8xf32>
    %428 = vector.shape_cast %427 : vector<8xf32> to vector<8x1xf32>
    %429 = vector.extract_strided_slice %425 {offsets = [0, 0], sizes = [4, 1], strides = [1, 1]} : vector<8x1xf32> to vector<4x1xf32>
    %430 = vector.extract_strided_slice %428 {offsets = [0, 0], sizes = [4, 1], strides = [1, 1]} : vector<8x1xf32> to vector<4x1xf32>
    %431 = vector.extract_strided_slice %425 {offsets = [4, 0], sizes = [4, 1], strides = [1, 1]} : vector<8x1xf32> to vector<4x1xf32>
    %432 = arith.addf %429, %431 : vector<4x1xf32>
    %433 = vector.extract_strided_slice %428 {offsets = [4, 0], sizes = [4, 1], strides = [1, 1]} : vector<8x1xf32> to vector<4x1xf32>
    %434 = arith.addf %430, %433 : vector<4x1xf32>
    %cst_134 = arith.constant 0.001953125 : f32
    %435 = vector.broadcast %cst_134 : f32 to vector<4x1xf32>
    %436 = arith.mulf %432, %435 : vector<4x1xf32>
    %cst_135 = arith.constant 0.001953125 : f32
    %437 = vector.broadcast %cst_135 : f32 to vector<4x1xf32>
    %438 = arith.mulf %434, %437 : vector<4x1xf32>
    %439 = arith.mulf %436, %436 : vector<4x1xf32>
    %440 = arith.subf %438, %439 : vector<4x1xf32>
    %cst_136 = arith.constant 0.000000e+00 : f32
    %441 = vector.broadcast %cst_136 : f32 to vector<4x1xf32>
    %442 = arith.maximumf %440, %441 : vector<4x1xf32>
    %cst_137 = arith.constant 9.99999974E-6 : f32
    %443 = vector.broadcast %cst_137 : f32 to vector<4x1xf32>
    %444 = arith.addf %442, %443 : vector<4x1xf32>
    %445 = math.rsqrt %444 : vector<4x1xf32>
    %446 = arith.mulf %445, %421 : vector<4x1xf32>
    %447 = arith.mulf %436, %446 : vector<4x1xf32>
    %448 = arith.subf %423, %447 : vector<4x1xf32>
    %449 = tpu.concatenate %446, %446 in 0 : vector<4x1xf32>, vector<4x1xf32> -> vector<8x1xf32>
    %450 = tpu.concatenate %448, %448 in 0 : vector<4x1xf32>, vector<4x1xf32> -> vector<8x1xf32>
    %451 = vector.broadcast %449 : vector<8x1xf32> to vector<8x256xf32>
    %452 = arith.mulf %419, %451 : vector<8x256xf32>
    %453 = vector.broadcast %450 : vector<8x1xf32> to vector<8x256xf32>
    %454 = arith.addf %452, %453 : vector<8x256xf32>
    %cst_138 = arith.constant 5.000000e-01 : f32
    %455 = vector.broadcast %cst_138 : f32 to vector<8x256xf32>
    %456 = arith.mulf %455, %454 : vector<8x256xf32>
    %cst_139 = arith.constant 0.707106769 : f32
    %457 = vector.broadcast %cst_139 : f32 to vector<8x256xf32>
    %458 = arith.mulf %454, %457 : vector<8x256xf32>
    %cst_140 = arith.constant 0.000000e+00 : f32
    %459 = vector.broadcast %cst_140 : f32 to vector<8x256xf32>
    %460 = arith.cmpf olt, %458, %459 : vector<8x256xf32>
    %cst_141 = arith.constant -1.000000e+00 : f32
    %cst_142 = arith.constant 1.000000e+00 : f32
    %461 = vector.broadcast %cst_141 : f32 to vector<8x256xf32>
    %462 = vector.broadcast %cst_142 : f32 to vector<8x256xf32>
    %463 = arith.select %460, %461, %462 : vector<8x256xi1>, vector<8x256xf32>
    %464 = math.absf %458 : vector<8x256xf32>
    %cst_143 = arith.constant 0.327591091 : f32
    %465 = vector.broadcast %cst_143 : f32 to vector<8x256xf32>
    %466 = arith.mulf %465, %464 : vector<8x256xf32>
    %cst_144 = arith.constant 1.000000e+00 : f32
    %467 = vector.broadcast %cst_144 : f32 to vector<8x256xf32>
    %468 = arith.addf %467, %466 : vector<8x256xf32>
    %469 = tpu.reciprocal %468 {approx = true} : vector<8x256xf32> -> vector<8x256xf32>
    %470 = arith.mulf %468, %469 : vector<8x256xf32>
    %cst_145 = arith.constant 2.000000e+00 : f32
    %471 = vector.broadcast %cst_145 : f32 to vector<8x256xf32>
    %472 = arith.subf %471, %470 : vector<8x256xf32>
    %473 = arith.mulf %469, %472 : vector<8x256xf32>
    %cst_146 = arith.constant 1.06140542 : f32
    %474 = vector.broadcast %cst_146 : f32 to vector<8x256xf32>
    %475 = arith.mulf %474, %473 : vector<8x256xf32>
    %cst_147 = arith.constant -1.45315206 : f32
    %476 = vector.broadcast %cst_147 : f32 to vector<8x256xf32>
    %477 = arith.addf %475, %476 : vector<8x256xf32>
    %478 = arith.mulf %477, %473 : vector<8x256xf32>
    %cst_148 = arith.constant 1.42141378 : f32
    %479 = vector.broadcast %cst_148 : f32 to vector<8x256xf32>
    %480 = arith.addf %478, %479 : vector<8x256xf32>
    %481 = arith.mulf %480, %473 : vector<8x256xf32>
    %cst_149 = arith.constant -0.284496725 : f32
    %482 = vector.broadcast %cst_149 : f32 to vector<8x256xf32>
    %483 = arith.addf %481, %482 : vector<8x256xf32>
    %484 = arith.mulf %483, %473 : vector<8x256xf32>
    %cst_150 = arith.constant 0.254829586 : f32
    %485 = vector.broadcast %cst_150 : f32 to vector<8x256xf32>
    %486 = arith.addf %484, %485 : vector<8x256xf32>
    %487 = arith.mulf %486, %473 : vector<8x256xf32>
    %cst_151 = arith.constant 0.000000e+00 : f32
    %488 = vector.broadcast %cst_151 : f32 to vector<8x256xf32>
    %489 = arith.subf %488, %464 : vector<8x256xf32>
    %490 = arith.mulf %489, %464 : vector<8x256xf32>
    %491 = math.exp %490 : vector<8x256xf32>
    %492 = arith.mulf %487, %491 : vector<8x256xf32>
    %cst_152 = arith.constant 1.000000e+00 : f32
    %493 = vector.broadcast %cst_152 : f32 to vector<8x256xf32>
    %494 = arith.subf %493, %492 : vector<8x256xf32>
    %495 = arith.mulf %463, %494 : vector<8x256xf32>
    %cst_153 = arith.constant 1.000000e+00 : f32
    %496 = vector.broadcast %cst_153 : f32 to vector<8x256xf32>
    %497 = arith.addf %496, %495 : vector<8x256xf32>
    %498 = arith.mulf %456, %497 : vector<8x256xf32>
    %c2_154 = arith.constant 2 : index
    %c0_155 = arith.constant 0 : index
    %c0_156 = arith.constant 0 : index
    %499 = vector.load %arg8[%c2_154, %c0_155, %c0_156] : memref<4x8x256xf32, #tpu.memory_space<vmem>>, vector<1x8x256xf32>
    %500 = vector.shape_cast %499 : vector<1x8x256xf32> to vector<8x256xf32>
    %501 = vector.shape_cast %498 : vector<8x256xf32> to vector<1x8x256xf32>
    tpu.vector_store %arg8[%c2_154, %c0_155, %c0_156], %501 {strides = array<i32>} : memref<4x8x256xf32, #tpu.memory_space<vmem>>, vector<1x8x256xf32>,
    %c3 = arith.constant 3 : index
    %c0_157 = arith.constant 0 : index
    %c0_158 = arith.constant 0 : index
    %502 = vector.load %arg1[%c3, %c0_157, %c0_158] : memref<4x8x256xf32, #tpu.memory_space<vmem>>, vector<1x8x256xf32>
    %503 = vector.shape_cast %502 : vector<1x8x256xf32> to vector<8x256xf32>
    %c3_159 = arith.constant 3 : index
    %c0_160 = arith.constant 0 : index
    %c0_161 = arith.constant 0 : index
    %504 = vector.load %arg3[%c3_159, %c0_160, %c0_161] : memref<4x8x9xf32, #tpu.memory_space<vmem>>, vector<1x8x9xf32>
    %505 = vector.shape_cast %504 : vector<1x8x9xf32> to vector<8x9xf32>
    %c3_162 = arith.constant 3 : index
    %c0_163 = arith.constant 0 : index
    %c0_164 = arith.constant 0 : index
    %506 = vector.load %arg4[%c3_162, %c0_163, %c0_164] : memref<4x8x1xf32, #tpu.memory_space<vmem>>, vector<1x8x1xf32>
    %507 = vector.shape_cast %506 : vector<1x8x1xf32> to vector<8x1xf32>
    %c48_i32 = arith.constant 48 : i32
    %508 = tpu.dynamic_rotate %503 by %c48_i32 dim 1 : vector<8x256xf32>, i32 -> vector<8x256xf32>
    %c3_i32 = arith.constant 3 : i32
    %509 = vector.broadcast %c3_i32 : i32 to vector<1x256xi32>
    %510 = arith.cmpi sge, %0, %509 : vector<1x256xi32>
    %cst_165 = arith.constant 0.000000e+00 : f32
    %511 = vector.shape_cast %510 : vector<1x256xi1> to vector<1x256xi1>
    %512 = vector.broadcast %511 : vector<1x256xi1> to vector<8x256xi1>
    %513 = vector.broadcast %cst_165 : f32 to vector<8x256xf32>
    %514 = arith.select %512, %508, %513 : vector<8x256xi1>, vector<8x256xf32>
    %c3_i32_166 = arith.constant 3 : i32
    %515 = tpu.dynamic_rotate %514 by %c3_i32_166 dim 1 : vector<8x256xf32>, i32 -> vector<8x256xf32>
    %c3_i32_167 = arith.constant 3 : i32
    %516 = vector.broadcast %c3_i32_167 : i32 to vector<1x256xi32>
    %517 = arith.cmpi sge, %1, %516 : vector<1x256xi32>
    %cst_168 = arith.constant 0.000000e+00 : f32
    %518 = vector.shape_cast %517 : vector<1x256xi1> to vector<1x256xi1>
    %519 = vector.broadcast %518 : vector<1x256xi1> to vector<8x256xi1>
    %520 = vector.broadcast %cst_168 : f32 to vector<8x256xf32>
    %521 = arith.select %519, %515, %520 : vector<8x256xi1>, vector<8x256xf32>
    %522 = vector.extract_strided_slice %505 {offsets = [0, 0], sizes = [8, 1], strides = [1, 1]} : vector<8x9xf32> to vector<8x1xf32>
    %523 = vector.broadcast %522 : vector<8x1xf32> to vector<8x256xf32>
    %524 = arith.mulf %523, %521 : vector<8x256xf32>
    %525 = vector.extract_strided_slice %505 {offsets = [0, 1], sizes = [8, 1], strides = [1, 1]} : vector<8x9xf32> to vector<8x1xf32>
    %526 = vector.broadcast %525 : vector<8x1xf32> to vector<8x256xf32>
    %527 = arith.mulf %526, %514 : vector<8x256xf32>
    %528 = arith.addf %524, %527 : vector<8x256xf32>
    %c253_i32 = arith.constant 253 : i32
    %529 = tpu.dynamic_rotate %514 by %c253_i32 dim 1 : vector<8x256xf32>, i32 -> vector<8x256xf32>
    %c13_i32 = arith.constant 13 : i32
    %530 = vector.broadcast %c13_i32 : i32 to vector<1x256xi32>
    %531 = arith.cmpi slt, %1, %530 : vector<1x256xi32>
    %cst_169 = arith.constant 0.000000e+00 : f32
    %532 = vector.shape_cast %531 : vector<1x256xi1> to vector<1x256xi1>
    %533 = vector.broadcast %532 : vector<1x256xi1> to vector<8x256xi1>
    %534 = vector.broadcast %cst_169 : f32 to vector<8x256xf32>
    %535 = arith.select %533, %529, %534 : vector<8x256xi1>, vector<8x256xf32>
    %536 = vector.extract_strided_slice %505 {offsets = [0, 2], sizes = [8, 1], strides = [1, 1]} : vector<8x9xf32> to vector<8x1xf32>
    %537 = vector.broadcast %536 : vector<8x1xf32> to vector<8x256xf32>
    %538 = arith.mulf %537, %535 : vector<8x256xf32>
    %539 = arith.addf %528, %538 : vector<8x256xf32>
    %c3_i32_170 = arith.constant 3 : i32
    %540 = tpu.dynamic_rotate %503 by %c3_i32_170 dim 1 : vector<8x256xf32>, i32 -> vector<8x256xf32>
    %c3_i32_171 = arith.constant 3 : i32
    %541 = vector.broadcast %c3_i32_171 : i32 to vector<1x256xi32>
    %542 = arith.cmpi sge, %1, %541 : vector<1x256xi32>
    %cst_172 = arith.constant 0.000000e+00 : f32
    %543 = vector.shape_cast %542 : vector<1x256xi1> to vector<1x256xi1>
    %544 = vector.broadcast %543 : vector<1x256xi1> to vector<8x256xi1>
    %545 = vector.broadcast %cst_172 : f32 to vector<8x256xf32>
    %546 = arith.select %544, %540, %545 : vector<8x256xi1>, vector<8x256xf32>
    %547 = vector.extract_strided_slice %505 {offsets = [0, 3], sizes = [8, 1], strides = [1, 1]} : vector<8x9xf32> to vector<8x1xf32>
    %548 = vector.broadcast %547 : vector<8x1xf32> to vector<8x256xf32>
    %549 = arith.mulf %548, %546 : vector<8x256xf32>
    %550 = vector.extract_strided_slice %505 {offsets = [0, 4], sizes = [8, 1], strides = [1, 1]} : vector<8x9xf32> to vector<8x1xf32>
    %551 = vector.broadcast %550 : vector<8x1xf32> to vector<8x256xf32>
    %552 = arith.mulf %551, %503 : vector<8x256xf32>
    %553 = arith.addf %549, %552 : vector<8x256xf32>
    %c253_i32_173 = arith.constant 253 : i32
    %554 = tpu.dynamic_rotate %503 by %c253_i32_173 dim 1 : vector<8x256xf32>, i32 -> vector<8x256xf32>
    %c13_i32_174 = arith.constant 13 : i32
    %555 = vector.broadcast %c13_i32_174 : i32 to vector<1x256xi32>
    %556 = arith.cmpi slt, %1, %555 : vector<1x256xi32>
    %cst_175 = arith.constant 0.000000e+00 : f32
    %557 = vector.shape_cast %556 : vector<1x256xi1> to vector<1x256xi1>
    %558 = vector.broadcast %557 : vector<1x256xi1> to vector<8x256xi1>
    %559 = vector.broadcast %cst_175 : f32 to vector<8x256xf32>
    %560 = arith.select %558, %554, %559 : vector<8x256xi1>, vector<8x256xf32>
    %561 = vector.extract_strided_slice %505 {offsets = [0, 5], sizes = [8, 1], strides = [1, 1]} : vector<8x9xf32> to vector<8x1xf32>
    %562 = vector.broadcast %561 : vector<8x1xf32> to vector<8x256xf32>
    %563 = arith.mulf %562, %560 : vector<8x256xf32>
    %564 = arith.addf %553, %563 : vector<8x256xf32>
    %c208_i32 = arith.constant 208 : i32
    %565 = tpu.dynamic_rotate %503 by %c208_i32 dim 1 : vector<8x256xf32>, i32 -> vector<8x256xf32>
    %c13_i32_176 = arith.constant 13 : i32
    %566 = vector.broadcast %c13_i32_176 : i32 to vector<1x256xi32>
    %567 = arith.cmpi slt, %0, %566 : vector<1x256xi32>
    %cst_177 = arith.constant 0.000000e+00 : f32
    %568 = vector.shape_cast %567 : vector<1x256xi1> to vector<1x256xi1>
    %569 = vector.broadcast %568 : vector<1x256xi1> to vector<8x256xi1>
    %570 = vector.broadcast %cst_177 : f32 to vector<8x256xf32>
    %571 = arith.select %569, %565, %570 : vector<8x256xi1>, vector<8x256xf32>
    %c3_i32_178 = arith.constant 3 : i32
    %572 = tpu.dynamic_rotate %571 by %c3_i32_178 dim 1 : vector<8x256xf32>, i32 -> vector<8x256xf32>
    %c3_i32_179 = arith.constant 3 : i32
    %573 = vector.broadcast %c3_i32_179 : i32 to vector<1x256xi32>
    %574 = arith.cmpi sge, %1, %573 : vector<1x256xi32>
    %cst_180 = arith.constant 0.000000e+00 : f32
    %575 = vector.shape_cast %574 : vector<1x256xi1> to vector<1x256xi1>
    %576 = vector.broadcast %575 : vector<1x256xi1> to vector<8x256xi1>
    %577 = vector.broadcast %cst_180 : f32 to vector<8x256xf32>
    %578 = arith.select %576, %572, %577 : vector<8x256xi1>, vector<8x256xf32>
    %579 = vector.extract_strided_slice %505 {offsets = [0, 6], sizes = [8, 1], strides = [1, 1]} : vector<8x9xf32> to vector<8x1xf32>
    %580 = vector.broadcast %579 : vector<8x1xf32> to vector<8x256xf32>
    %581 = arith.mulf %580, %578 : vector<8x256xf32>
    %582 = vector.extract_strided_slice %505 {offsets = [0, 7], sizes = [8, 1], strides = [1, 1]} : vector<8x9xf32> to vector<8x1xf32>
    %583 = vector.broadcast %582 : vector<8x1xf32> to vector<8x256xf32>
    %584 = arith.mulf %583, %571 : vector<8x256xf32>
    %585 = arith.addf %581, %584 : vector<8x256xf32>
    %c253_i32_181 = arith.constant 253 : i32
    %586 = tpu.dynamic_rotate %571 by %c253_i32_181 dim 1 : vector<8x256xf32>, i32 -> vector<8x256xf32>
    %c13_i32_182 = arith.constant 13 : i32
    %587 = vector.broadcast %c13_i32_182 : i32 to vector<1x256xi32>
    %588 = arith.cmpi slt, %1, %587 : vector<1x256xi32>
    %cst_183 = arith.constant 0.000000e+00 : f32
    %589 = vector.shape_cast %588 : vector<1x256xi1> to vector<1x256xi1>
    %590 = vector.broadcast %589 : vector<1x256xi1> to vector<8x256xi1>
    %591 = vector.broadcast %cst_183 : f32 to vector<8x256xf32>
    %592 = arith.select %590, %586, %591 : vector<8x256xi1>, vector<8x256xf32>
    %593 = vector.extract_strided_slice %505 {offsets = [0, 8], sizes = [8, 1], strides = [1, 1]} : vector<8x9xf32> to vector<8x1xf32>
    %594 = vector.broadcast %593 : vector<8x1xf32> to vector<8x256xf32>
    %595 = arith.mulf %594, %592 : vector<8x256xf32>
    %596 = arith.addf %585, %595 : vector<8x256xf32>
    %597 = arith.addf %539, %564 : vector<8x256xf32>
    %598 = vector.broadcast %507 : vector<8x1xf32> to vector<8x256xf32>
    %599 = arith.addf %596, %598 : vector<8x256xf32>
    %600 = arith.addf %597, %599 : vector<8x256xf32>
    %c3_184 = arith.constant 3 : index
    %c0_185 = arith.constant 0 : index
    %c0_186 = arith.constant 0 : index
    %601 = vector.load %arg5[%c3_184, %c0_185, %c0_186] : memref<4x4x1xf32, #tpu.memory_space<vmem>>, vector<1x4x1xf32>
    %602 = vector.shape_cast %601 : vector<1x4x1xf32> to vector<4x1xf32>
    %c3_187 = arith.constant 3 : index
    %c0_188 = arith.constant 0 : index
    %c0_189 = arith.constant 0 : index
    %603 = vector.load %arg6[%c3_187, %c0_188, %c0_189] : memref<4x4x1xf32, #tpu.memory_space<vmem>>, vector<1x4x1xf32>
    %604 = vector.shape_cast %603 : vector<1x4x1xf32> to vector<4x1xf32>
    %cst_190 = arith.constant dense<0.000000e+00> : vector<8xf32>
    %605 = vector.multi_reduction <add>, %600, %cst_190 [1] : vector<8x256xf32> to vector<8xf32>
    %606 = vector.shape_cast %605 : vector<8xf32> to vector<8x1xf32>
    %607 = arith.mulf %600, %600 : vector<8x256xf32>
    %cst_191 = arith.constant dense<0.000000e+00> : vector<8xf32>
    %608 = vector.multi_reduction <add>, %607, %cst_191 [1] : vector<8x256xf32> to vector<8xf32>
    %609 = vector.shape_cast %608 : vector<8xf32> to vector<8x1xf32>
    %610 = vector.extract_strided_slice %606 {offsets = [0, 0], sizes = [4, 1], strides = [1, 1]} : vector<8x1xf32> to vector<4x1xf32>
    %611 = vector.extract_strided_slice %609 {offsets = [0, 0], sizes = [4, 1], strides = [1, 1]} : vector<8x1xf32> to vector<4x1xf32>
    %612 = vector.extract_strided_slice %606 {offsets = [4, 0], sizes = [4, 1], strides = [1, 1]} : vector<8x1xf32> to vector<4x1xf32>
    %613 = arith.addf %610, %612 : vector<4x1xf32>
    %614 = vector.extract_strided_slice %609 {offsets = [4, 0], sizes = [4, 1], strides = [1, 1]} : vector<8x1xf32> to vector<4x1xf32>
    %615 = arith.addf %611, %614 : vector<4x1xf32>
    %cst_192 = arith.constant 0.001953125 : f32
    %616 = vector.broadcast %cst_192 : f32 to vector<4x1xf32>
    %617 = arith.mulf %613, %616 : vector<4x1xf32>
    %cst_193 = arith.constant 0.001953125 : f32
    %618 = vector.broadcast %cst_193 : f32 to vector<4x1xf32>
    %619 = arith.mulf %615, %618 : vector<4x1xf32>
    %620 = arith.mulf %617, %617 : vector<4x1xf32>
    %621 = arith.subf %619, %620 : vector<4x1xf32>
    %cst_194 = arith.constant 0.000000e+00 : f32
    %622 = vector.broadcast %cst_194 : f32 to vector<4x1xf32>
    %623 = arith.maximumf %621, %622 : vector<4x1xf32>
    %cst_195 = arith.constant 9.99999974E-6 : f32
    %624 = vector.broadcast %cst_195 : f32 to vector<4x1xf32>
    %625 = arith.addf %623, %624 : vector<4x1xf32>
    %626 = math.rsqrt %625 : vector<4x1xf32>
    %627 = arith.mulf %626, %602 : vector<4x1xf32>
    %628 = arith.mulf %617, %627 : vector<4x1xf32>
    %629 = arith.subf %604, %628 : vector<4x1xf32>
    %630 = tpu.concatenate %627, %627 in 0 : vector<4x1xf32>, vector<4x1xf32> -> vector<8x1xf32>
    %631 = tpu.concatenate %629, %629 in 0 : vector<4x1xf32>, vector<4x1xf32> -> vector<8x1xf32>
    %632 = vector.broadcast %630 : vector<8x1xf32> to vector<8x256xf32>
    %633 = arith.mulf %600, %632 : vector<8x256xf32>
    %634 = vector.broadcast %631 : vector<8x1xf32> to vector<8x256xf32>
    %635 = arith.addf %633, %634 : vector<8x256xf32>
    %cst_196 = arith.constant 5.000000e-01 : f32
    %636 = vector.broadcast %cst_196 : f32 to vector<8x256xf32>
    %637 = arith.mulf %636, %635 : vector<8x256xf32>
    %cst_197 = arith.constant 0.707106769 : f32
    %638 = vector.broadcast %cst_197 : f32 to vector<8x256xf32>
    %639 = arith.mulf %635, %638 : vector<8x256xf32>
    %cst_198 = arith.constant 0.000000e+00 : f32
    %640 = vector.broadcast %cst_198 : f32 to vector<8x256xf32>
    %641 = arith.cmpf olt, %639, %640 : vector<8x256xf32>
    %cst_199 = arith.constant -1.000000e+00 : f32
    %cst_200 = arith.constant 1.000000e+00 : f32
    %642 = vector.broadcast %cst_199 : f32 to vector<8x256xf32>
    %643 = vector.broadcast %cst_200 : f32 to vector<8x256xf32>
    %644 = arith.select %641, %642, %643 : vector<8x256xi1>, vector<8x256xf32>
    %645 = math.absf %639 : vector<8x256xf32>
    %cst_201 = arith.constant 0.327591091 : f32
    %646 = vector.broadcast %cst_201 : f32 to vector<8x256xf32>
    %647 = arith.mulf %646, %645 : vector<8x256xf32>
    %cst_202 = arith.constant 1.000000e+00 : f32
    %648 = vector.broadcast %cst_202 : f32 to vector<8x256xf32>
    %649 = arith.addf %648, %647 : vector<8x256xf32>
    %650 = tpu.reciprocal %649 {approx = true} : vector<8x256xf32> -> vector<8x256xf32>
    %651 = arith.mulf %649, %650 : vector<8x256xf32>
    %cst_203 = arith.constant 2.000000e+00 : f32
    %652 = vector.broadcast %cst_203 : f32 to vector<8x256xf32>
    %653 = arith.subf %652, %651 : vector<8x256xf32>
    %654 = arith.mulf %650, %653 : vector<8x256xf32>
    %cst_204 = arith.constant 1.06140542 : f32
    %655 = vector.broadcast %cst_204 : f32 to vector<8x256xf32>
    %656 = arith.mulf %655, %654 : vector<8x256xf32>
    %cst_205 = arith.constant -1.45315206 : f32
    %657 = vector.broadcast %cst_205 : f32 to vector<8x256xf32>
    %658 = arith.addf %656, %657 : vector<8x256xf32>
    %659 = arith.mulf %658, %654 : vector<8x256xf32>
    %cst_206 = arith.constant 1.42141378 : f32
    %660 = vector.broadcast %cst_206 : f32 to vector<8x256xf32>
    %661 = arith.addf %659, %660 : vector<8x256xf32>
    %662 = arith.mulf %661, %654 : vector<8x256xf32>
    %cst_207 = arith.constant -0.284496725 : f32
    %663 = vector.broadcast %cst_207 : f32 to vector<8x256xf32>
    %664 = arith.addf %662, %663 : vector<8x256xf32>
    %665 = arith.mulf %664, %654 : vector<8x256xf32>
    %cst_208 = arith.constant 0.254829586 : f32
    %666 = vector.broadcast %cst_208 : f32 to vector<8x256xf32>
    %667 = arith.addf %665, %666 : vector<8x256xf32>
    %668 = arith.mulf %667, %654 : vector<8x256xf32>
    %cst_209 = arith.constant 0.000000e+00 : f32
    %669 = vector.broadcast %cst_209 : f32 to vector<8x256xf32>
    %670 = arith.subf %669, %645 : vector<8x256xf32>
    %671 = arith.mulf %670, %645 : vector<8x256xf32>
    %672 = math.exp %671 : vector<8x256xf32>
    %673 = arith.mulf %668, %672 : vector<8x256xf32>
    %cst_210 = arith.constant 1.000000e+00 : f32
    %674 = vector.broadcast %cst_210 : f32 to vector<8x256xf32>
    %675 = arith.subf %674, %673 : vector<8x256xf32>
    %676 = arith.mulf %644, %675 : vector<8x256xf32>
    %cst_211 = arith.constant 1.000000e+00 : f32
    %677 = vector.broadcast %cst_211 : f32 to vector<8x256xf32>
    %678 = arith.addf %677, %676 : vector<8x256xf32>
    %679 = arith.mulf %637, %678 : vector<8x256xf32>
    %c3_212 = arith.constant 3 : index
    %c0_213 = arith.constant 0 : index
    %c0_214 = arith.constant 0 : index
    %680 = vector.load %arg8[%c3_212, %c0_213, %c0_214] : memref<4x8x256xf32, #tpu.memory_space<vmem>>, vector<1x8x256xf32>
    %681 = vector.shape_cast %680 : vector<1x8x256xf32> to vector<8x256xf32>
    %682 = vector.shape_cast %679 : vector<8x256xf32> to vector<1x8x256xf32>
    tpu.vector_store %arg8[%c3_212, %c0_213, %c0_214], %682 {strides = array<i32>} : memref<4x8x256xf32, #tpu.memory_space<vmem>>, vector<1x8x256xf32>,
    return
  }
  func.func @transform_0(%arg0: i32) -> (i32, i32, i32) {
    %c0_i32 = arith.constant 0 : i32
    %c0_i32_0 = arith.constant 0 : i32
    %c0_i32_1 = arith.constant 0 : i32
    return %arg0, %c0_i32, %c0_i32_0 : i32, i32, i32
  }
  func.func @transform_1(%arg0: i32) -> (i32, i32) {
    %c0_i32 = arith.constant 0 : i32
    %c0_i32_0 = arith.constant 0 : i32
    %c0_i32_1 = arith.constant 0 : i32
    return %c0_i32, %c0_i32_0 : i32, i32
  }
  func.func @transform_2(%arg0: i32) -> (i32, i32, i32) {
    %c0_i32 = arith.constant 0 : i32
    %c0_i32_0 = arith.constant 0 : i32
    %c0_i32_1 = arith.constant 0 : i32
    return %arg0, %c0_i32, %c0_i32_0 : i32, i32, i32
  }
  func.func @transform_3(%arg0: i32) -> (i32, i32, i32) {
    %c0_i32 = arith.constant 0 : i32
    %c0_i32_0 = arith.constant 0 : i32
    %c0_i32_1 = arith.constant 0 : i32
    return %arg0, %c0_i32, %c0_i32_0 : i32, i32, i32
  }
  func.func @transform_4(%arg0: i32) -> (i32, i32, i32) {
    %c0_i32 = arith.constant 0 : i32
    %c0_i32_0 = arith.constant 0 : i32
    %c0_i32_1 = arith.constant 0 : i32
    return %arg0, %c0_i32, %c0_i32_0 : i32, i32, i32
  }
  func.func @transform_5(%arg0: i32) -> (i32, i32, i32) {
    %c0_i32 = arith.constant 0 : i32
    %c0_i32_0 = arith.constant 0 : i32
    %c0_i32_1 = arith.constant 0 : i32
    return %arg0, %c0_i32, %c0_i32_0 : i32, i32, i32
  }
  func.func @transform_6(%arg0: i32) -> (i32, i32) {
    %c0_i32 = arith.constant 0 : i32
    %c0_i32_0 = arith.constant 0 : i32
    %c0_i32_1 = arith.constant 0 : i32
    return %c0_i32, %c0_i32_0 : i32, i32
  }
  func.func @transform_7(%arg0: i32) -> (i32, i32, i32) {
    %c0_i32 = arith.constant 0 : i32
    %c0_i32_0 = arith.constant 0 : i32
    %c0_i32_1 = arith.constant 0 : i32
    return %arg0, %c0_i32, %c0_i32_0 : i32, i32, i32
  }
}

</mosaic_0001>

<bundles_post_ra>
// kernel: tile.21
= control target key start
LH: loop header
LB: loop body
LE: loop exit
PB: predicated region body
PF: predicated region fallthrough
CT: control target
= control target key end

     0   :  { %s22_s0 = inlined_call_operand.vmem [shape: f32[4], index: 0, kind: input, shape index: {}]   ;;  %s23_s1 = inlined_call_operand.vmem [shape: f32[2,4], index: 1, kind: output, shape index: {}]  }
   0x1   :  { %v4_v0 = vld [vmem:[%s22_s0] ss:$0 sm:$0xff] }
   0x2   :  { %5 = vst [vmem:[%s23_s1] sm:$0x3] %v4_v0 }

// kernel: tile.27
= control target key start
LH: loop header
LB: loop body
LE: loop exit
PB: predicated region body
PF: predicated region fallthrough
CT: control target
= control target key end

     0   :  { %vm7_vm0 = vcmask 31744   ;;  %vm13_vm1 = vcmask 64544   ;;  %s39_s0 = inlined_call_operand.vmem [shape: f32[2,4], index: 0, kind: input, shape index: {}]   ;;  %s40_s1 = inlined_call_operand.vmem [shape: f32[1,8], index: 1, kind: output, shape index: {}]  }
   0x1   :  { %v4_v0 = vld [vmem:[%s39_s0] sm:$0x3]  ;;  %s22_s0 = smov 4  }
   0x2   :  { %5 = vst [vmem:[#allocation1] sm:$0x3] %v4_v0 }
   0x9   :  { %v10_v1 = vld [vmem:[#allocation1 + $0x1] sm:$0x1]   ;;  %v6_v2 = vld [vmem:[#allocation1] sm:$0x1]  }
   0xa   :  { %11 = vrot.lane.b32.xlu0 %v10_v1, %s22_s0  ;;  %8 = vst.msk [vmem:[#allocation0] sm:$0x1] %vm7_vm0, %v6_v2  }
  0x7c   :  { %v12_v3 = vpop.permute.xlu0 %11  }
  0x7d   :  { %14 = vst.msk [vmem:[#allocation0] sm:$0x1] %vm13_vm1, %v12_v3  }
  0x84   :  { %v18_v4 = vld [vmem:[#allocation0] sm:$0x1] }
  0x85   :  { %20 = vst [vmem:[%s40_s1] sm:$0x1] %v18_v4 }

// kernel: tile.26
= control target key start
LH: loop header
LB: loop body
LE: loop exit
PB: predicated region body
PF: predicated region fallthrough
CT: control target
= control target key end

     0   :  { %vm16_vm0 = vcmask 31744   ;;  %vm22_vm1 = vcmask 64544   ;;  %s57_s0 = inlined_call_operand.vmem [shape: f32[3,2,4], index: 0, kind: input, shape index: {}]   ;;  %s58_s1 = inlined_call_operand.vmem [shape: f32[3,8], index: 1, kind: output, shape index: {}]  }
   0x1   :  { %v31_v0 = vld [vmem:[%s57_s0 + $0x4] sm:$0x3]  ;;  %v32_v1 = vld [vmem:[%s57_s0 + $0x2] sm:$0x3]  ;;  %v13_v2 = vld [vmem:[%s57_s0] sm:$0x3] }
   0x2   :  { %8 = vst [vmem:[#allocation1 + $0x10] sm:$0x3] %v31_v0  ;;  %12 = vst [vmem:[#allocation1 + $0x8] sm:$0x3] %v32_v1  ;;  %s34_s0 = smov 4  }
   0x3   :  { %14 = vst [vmem:[#allocation1] sm:$0x3] %v13_v2 }
   0xa   :  { %v19_v3 = vld [vmem:[#allocation1 + $0x1] ss:$8 sm:$0x7]   ;;  %v15_v4 = vld [vmem:[#allocation1] ss:$8 sm:$0x7]  }
   0xb   :  { %20 = vrot.lane.b32.xlu0 %v19_v3, %s34_s0  ;;  %17 = vst.msk [vmem:[#allocation0] sm:$0x7] %vm16_vm0, %v15_v4  }
  0x7d   :  { %v21_v5 = vpop.permute.xlu0 %20  }
  0x7e   :  { %23 = vst.msk [vmem:[#allocation0] sm:$0x7] %vm22_vm1, %v21_v5  }
  0x85   :  { %v27_v6 = vld [vmem:[#allocation0] sm:$0xf] }
  0x86   :  { %29 = vst [vmem:[%s58_s1] sm:$0xf] %v27_v6 }

// kernel: ms_conv2d.1
= control target key start
LH: loop header
LB: loop body
LE: loop exit
PB: predicated region body
PF: predicated region fallthrough
CT: control target
= control target key end

     0   :  { %v1332_v0 = vmov 2   ;;  %v2317_v1 = vmov 0   ;;  %v1334_v3 = vmov 3   ;;  %v1335_v4 = vmov 1   ;;  %s1338_s11 = smov 48   ;;  %s1339_s12 = smov 16   ;;  %s2309_s1 = inlined_call_operand.vmem [shape: f32[4,4], index: 1, kind: input, shape index: {}]   ;;  %s2310_s3 = inlined_call_operand.vmem [shape: f32[4,8,1], index: 3, kind: input, shape index: {}]   ;;  %s2311_s0 = inlined_call_operand.vmem [shape: f32[4,8,256], index: 0, kind: input, shape index: {}]   ;;  %s2312_s2 = inlined_call_operand.vmem [shape: f32[4,8,9], index: 2, kind: input, shape index: {}]   ;;  %s2313_s6 = inlined_call_operand.vmem [shape: s32[2,256], index: 6, kind: input, shape index: {}]   ;;  %s2314_s4 = inlined_call_operand.vmem [shape: f32[4,4,1], index: 4, kind: input, shape index: {}]   ;;  %s2315_s5 = inlined_call_operand.vmem [shape: f32[4,4,1], index: 5, kind: input, shape index: {}]   ;;  %s2316_s7 = inlined_call_operand.vmem [shape: f32[4,8,256], index: 7, kind: output, shape index: {}]  }
   0x1   :  { %1265 = vset.pattern.permute.xlu1 %v1332_v0  ;;  %1263 = vset.pattern.permute.xlu0 %v2317_v1  ;;  %v32_v2 = vld [vmem:[%s2309_s1] sm:$0xf]  ;;  %v1407_v6 = vld [vmem:[%s2311_s0 + $0x28] sm:$0xff]  ;;  %s1336_s1 = smov 96   ;;  %v1415_v7 = vld [vmem:[%s2311_s0 + $0x38] sm:$0xff]  ;;  %v1337_v8 = vmov 4   ;;  %v38_v21 = vlaneseq }
   0x2   :  { %65 = vperm.xlu1 %1265, %v32_v2   ;;  %35 = vperm.xlu0 %1263, %v32_v2   ;;  %v31_v5 = vld [vmem:[%s2310_s3] sm:$0xff]  ;;  %v1420_v9 = vld [vmem:[%s2311_s0 + $0x10] sm:$0xff]  ;;  %v1427_v10 = vld [vmem:[%s2311_s0 + $0x18] sm:$0xff]  ;;  %s1340_s15 = smov 80   ;;  %s1341_s18 = smov 112   ;;  %v1344_v16 = vmov 6  }
   0x3   :  { %v1435_v11 = vld [vmem:[%s2312_s2 + $0x8] sm:$0xff]  ;;  %v1442_v12 = vld [vmem:[%s2312_s2 + $0x10] sm:$0xff]  ;;  %v1449_v13 = vld [vmem:[%s2311_s0 + $0x20] sm:$0xff]  ;;  %s1342_s25 = smov 32   ;;  %v1345_v17 = vmov 7   ;;  %v1346_v18 = vmov 5  }
   0x4   :  { %v1454_v14 = vld [vmem:[%s2312_s2 + $0x18] sm:$0xff]  ;;  %v1464_v15 = vld [vmem:[%s2311_s0 + $0x30] sm:$0xff]  ;;  %s1343_s2 = smov 1   ;;  %v1493_v20 = vld [vmem:[%s2313_s6] ss:$2 sm:$0x3] }
   0x5   :  { %vm284_vm0 = vcmp.ge.s32.totalorder %v1493_v20, 1  ;;  %v1498_v23 = vshrl.u32 %v38_v21, 7  ;;  %v1509_v28 = vand.u32 127, %v38_v21  ;;  %v29_v40 = vld [vmem:[%s2311_s0] sm:$0xff]  ;;  %v30_v41 = vld [vmem:[%s2311_s0 + $0x8] sm:$0xff]  ;;  %s1347_s10 = smov 127  }
   0x6   :  { %1266 = vset.pattern.permute.xlu1 %v1334_v3  ;;  %1264 = vset.pattern.permute.xlu0 %v1335_v4  ;;  %v285_v25 = vsel %vm284_vm0, 1, %v2317_v1  ;;  %vm148_vm4 = vcmask 1043456   ;;  %vm408_vm5 = vcmp.lt.s32.totalorder %v1493_v20, 15  ;;  %vm598_vm6 = vcmp.ge.s32.totalorder %v1493_v20, 2  ;;  %s1352_s20 = smov 125  }
   0x7   :  { %81 = vperm.xlu1 %1266, %v32_v2   ;;  %49 = vperm.xlu0 %1264, %v32_v2   ;;  %v1504_v26 = vsub.s32 0, %v1498_v23  ;;  %v1507_v27 = vsub.s32 1, %v1498_v23  ;;  %vm281_vm1 = vcmp.lt.s32.totalorder %v1509_v28, 16  ;;  %v98_v34 = vsub.s32 4, %v1498_v23 }
   0x8   :  { %v108_v35 = vsub.s32 5, %v1498_v23  ;;  %v120_v47 = vsub.s32 6, %v1498_v23  ;;  %v132_v56 = vsub.s32 7, %v1498_v23  ;;  %v70_v62 = vsub.s32 2, %v1498_v23 }
   0x9   :  { %v289_v29 = vrot.slane %v285_v25, %v1504_v26  ;;  %v293_v30 = vrot.slane %v285_v25, %v1507_v27  ;;  %v99_v43 = vrot.slane %v29_v40, %v98_v34  ;;  %v103_v44 = vrot.slane %v30_v41, %v98_v34 }
   0xa   :  { %v109_v45 = vrot.slane %v29_v40, %v108_v35  ;;  %v113_v46 = vrot.slane %v30_v41, %v108_v35  ;;  %v121_v54 = vrot.slane %v29_v40, %v120_v47  ;;  %v125_v55 = vrot.slane %v30_v41, %v120_v47 }
   0xb   :  { %1267 = vset.pattern.permute.xlu1 %v2317_v1  ;;  %717 = vrot.lane.b32.xlu0 %v1407_v6, %s1336_s1  ;;  %vm294_vm2 = vcmp.eq.s32.totalorder %v289_v29, 1  ;;  %vm295_vm3 = vcmp.eq.s32.totalorder %v293_v30, 1  ;;  %v41_v57 = vrot.slane %v29_v40, %v1504_v26  ;;  %v45_v58 = vrot.slane %v30_v41, %v1504_v26 }
   0xc   :  { %153 = vperm.xlu1 %1267, %v31_v5   ;;  %1270 = vset.pattern.permute.xlu0 %v1337_v8  ;;  %v55_v59 = vrot.slane %v29_v40, %v1507_v27  ;;  %v59_v60 = vrot.slane %v30_v41, %v1507_v27  ;;  %v133_v5 = vrot.slane %v29_v40, %v132_v56  ;;  %v86_v30 = vsub.s32 3, %v1498_v23 }
   0xd   :  { %v137_v8 = vrot.slane %v30_v41, %v132_v56  ;;  %v75_v34 = vrot.slane %v30_v41, %v70_v62  ;;  %vm405_vm7 = vcmp.lt.s32.totalorder %v1509_v28, 112  ;;  %vm595_vm10 = vcmp.lt.s32.totalorder %v1509_v28, 32 }
   0xe   :  { %v91_v47 = vrot.slane %v30_v41, %v86_v30  ;;  %vm722_vm11 = vcmp.lt.s32.totalorder %v1493_v20, 14  ;;  %vm912_vm14 = vcmp.ge.s32.totalorder %v1493_v20, 3  ;;  %vm719_vm15 = vcmp.lt.s32.totalorder %v1509_v28, 96 }
   0xf   :  { %907 = vrot.lane.b32.xlu0 %v1415_v7, %s1338_s11 }
  0x10   :  { %275 = vrot.lane.b32.xlu1 %v1420_v9, %s1339_s12 }
  0x11   :  { %1268 = vset.pattern.permute.xlu1 %v1335_v4 }
  0x13   :  { %1031 = vrot.lane.b32.xlu0 %v1415_v7, %s1340_s15 }
  0x14   :  { %277 = vrot.lane.b32.xlu1 %v1427_v10, %s1339_s12 }
  0x17   :  { %378 = vperm.xlu0 %1270, %v1435_v11  }
  0x18   :  { %401 = vrot.lane.b32.xlu1 %v1420_v9, %s1341_s18 }
  0x1b   :  { %692 = vperm.xlu0 %1270, %v1442_v12  }
  0x1c   :  { %403 = vrot.lane.b32.xlu1 %v1427_v10, %s1341_s18 }
  0x1f   :  { %1006 = vperm.xlu0 %1270, %v1454_v14  }
  0x20   :  { %591 = vrot.lane.b32.xlu1 %v1449_v13, %s1342_s25 }
  0x23   :  { %1281 = vset.pattern.permute.xlu0 %v1346_v18 }
  0x24   :  { %593 = vrot.lane.b32.xlu1 %v1407_v6, %s1342_s25 }
  0x28   :  { %715 = vrot.lane.b32.xlu1 %v1449_v13, %s1336_s1 }
  0x2c   :  { %905 = vrot.lane.b32.xlu1 %v1464_v15, %s1338_s11  ;;  %s1349_s11 = smov 2  }
  0x30   :  { %1029 = vrot.lane.b32.xlu1 %v1464_v15, %s1340_s15 }
  0x34   :  { %327 = vperm.xlu1 %1268, %v1435_v11  }
  0x38   :  { %363 = vrot.lane.b32.xlu1 %v1420_v9, %s1343_s2 }
  0x39   :  { %1269 = vset.pattern.permute.xlu1 %v1334_v3 }
  0x3c   :  { %372 = vperm.xlu1 %1269, %v1435_v11  }
  0x40   :  { %1271 = vset.pattern.permute.xlu1 %v1344_v16 }
  0x41   :  { %431 = vperm.xlu1 %1271, %v1435_v11  }
  0x45   :  { %1272 = vset.pattern.permute.xlu1 %v1345_v17 }
  0x46   :  { %437 = vperm.xlu1 %1272, %v1435_v11  }
  0x4a   :  { %1273 = vset.pattern.permute.xlu1 %v1335_v4 }
  0x4b   :  { %641 = vperm.xlu1 %1273, %v1442_v12  }
  0x4f   :  { %1274 = vset.pattern.permute.xlu1 %v1334_v3 }
  0x50   :  { %686 = vperm.xlu1 %1274, %v1442_v12  }
  0x54   :  { %1275 = vset.pattern.permute.xlu1 %v1344_v16 }
  0x55   :  { %745 = vperm.xlu1 %1275, %v1442_v12  }
  0x59   :  { %1276 = vset.pattern.permute.xlu1 %v1345_v17 }
  0x5a   :  { %751 = vperm.xlu1 %1276, %v1442_v12  }
  0x5e   :  { %1277 = vset.pattern.permute.xlu1 %v1335_v4 }
  0x5f   :  { %955 = vperm.xlu1 %1277, %v1454_v14  }
  0x63   :  { %1278 = vset.pattern.permute.xlu1 %v1334_v3 }
  0x64   :  { %1000 = vperm.xlu1 %1278, %v1454_v14  }
  0x68   :  { %1279 = vset.pattern.permute.xlu1 %v1344_v16 }
  0x81   :  { %v1488_v19 = vpop.permute.xlu1 %65  ;;  %v36_v32 = vpop.permute.xlu0 %35 }
  0x82   :  { %v104_v50 = vmul.f32 %v99_v43, %v36_v32  ;;  %v105_v51 = vmul.f32 %v103_v44, %v36_v32  ;;  %v126_v3 = vmul.f32 %v121_v54, %v1488_v19  ;;  %v127_v4 = vmul.f32 %v125_v55, %v1488_v19 }
  0x83   :  { %v46_v16 = vmul.f32 %v41_v57, %v36_v32  ;;  %v47_v21 = vmul.f32 %v45_v58, %v36_v32  ;;  %v77_v23 = vmul.f32 %v75_v34, %v1488_v19 }
  0x86   :  { %v1495_v22 = vpop.permute.xlu1 %81  ;;  %v50_v48 = vpop.permute.xlu0 %49 }
  0x87   :  { %v114_v52 = vmul.f32 %v109_v45, %v50_v48  ;;  %v115_v53 = vmul.f32 %v113_v46, %v50_v48  ;;  %v60_v25 = vmul.f32 %v55_v59, %v50_v48  ;;  %v61_v29 = vmul.f32 %v59_v60, %v50_v48 }
  0x88   :  { %v139_v43 = vmul.f32 %v137_v8, %v1495_v22  ;;  %v87_v46 = vrot.slane %v29_v40, %v86_v30  ;;  %v93_v56 = vmul.f32 %v91_v47, %v1495_v22 }
  0x89   :  { %v116_v63 = vadd.f32 %v114_v52, %v104_v50  ;;  %v117_v2 = vadd.f32 %v115_v53, %v105_v51  ;;  %v62_v44 = vadd.f32 %v60_v25, %v46_v16  ;;  %v63_v45 = vadd.f32 %v61_v29, %v47_v21 }
  0x8a   :  { %v92_v55 = vmul.f32 %v87_v46, %v1495_v22  ;;  %v409_v25 = vsel %vm408_vm5, 1, %v2317_v1 }
  0x8b   :  { %v1500_v24 = vpop.permute.xlu1 %153  ;;  %v128_v35 = vadd.f32 %v126_v3, %v116_v63  ;;  %v79_v53 = vadd.f32 %v77_v23, %v63_v45  ;;  %v413_v30 = vrot.slane %v409_v25, %v1504_v26  ;;  %v913_v23 = vsel %vm912_vm14, 1, %v2317_v1 }
  0x8d   :  { %v95_v41 = vadd.f32 %v93_v56, %v79_v53  ;;  %vm418_vm8 = vcmp.eq.s32.totalorder %v413_v30, 1  ;;  %v921_v56 = vrot.slane %v913_v23, %v1507_v27 }
  0x8f   :  { %v276_v31 = vpop.permute.xlu1 %275 }
  0x93   :  { %v278_v33 = vpop.permute.xlu1 %277 }
  0x94   :  { %v283_v36 = vsel %vm281_vm1, %v278_v33, %v276_v31  ;;  %v282_v37 = vsel %vm281_vm1, %v276_v31, %v278_v33  ;;  %v71_v33 = vrot.slane %v29_v40, %v70_v62 }
  0x95   :  { %v1516_v38 = vsel %vm294_vm2, %v283_v36, 0.0  ;;  %v1518_v39 = vsel %vm295_vm3, %v282_v37, 0.0  ;;  %v129_v36 = vadd.f32 %v127_v4, %v117_v2  ;;  %v138_v37 = vmul.f32 %v133_v5, %v1495_v22 }
  0x96   :  { %298 = vrot.lane.b32.xlu0 %v1516_v38, %s1343_s2  ;;  %300 = vrot.lane.b32.xlu1 %v1518_v39, %s1343_s2  ;;  %v76_v32 = vmul.f32 %v71_v33, %v1488_v19  ;;  %v417_v33 = vrot.slane %v409_v25, %v1507_v27  ;;  %vm909_vm2 = vcmp.lt.s32.totalorder %v1509_v28, 48  ;;  %vm1036_vm3 = vcmp.lt.s32.totalorder %v1493_v20, 13 }
  0x97   :  { %v1530_v42 = vpop.permute.xlu1 %401  ;;  %v140_v48 = vadd.f32 %v138_v37, %v128_v35  ;;  %v141_v51 = vadd.f32 %v139_v43, %v129_v36  ;;  %v1037_v20 = vsel %vm1036_vm3, 1, %v2317_v1  ;;  %vm616_vm3 = vcmp.lt.s32.totalorder %v1509_v28, 2 }
  0x98   :  { %v78_v52 = vadd.f32 %v76_v32, %v62_v44  ;;  %vm419_vm9 = vcmp.eq.s32.totalorder %v417_v33, 1 }
  0x99   :  { %v144_v57 = vrot.slane %v140_v48, 4  ;;  %v145_v58 = vrot.slane %v141_v51, 4  ;;  %v917_v51 = vrot.slane %v913_v23, %v1504_v26 }
  0x9a   :  { %334 = vrot.lane.b32.xlu0 %v1516_v38, %s1347_s10  ;;  %336 = vrot.lane.b32.xlu1 %v1518_v39, %s1347_s10  ;;  %v94_v40 = vadd.f32 %v92_v55, %v78_v52 }
  0x9b   :  { %v1537_v49 = vpop.permute.xlu1 %403  ;;  %v150_v19 = vsel %vm148_vm4, %v95_v41, %v145_v58  ;;  %vm922_vm5 = vcmp.eq.s32.totalorder %v917_v51, 1 }
  0x9c   :  { %v149_v60 = vsel %vm148_vm4, %v94_v40, %v144_v57  ;;  %v1570_v63 = vadd.f32 %v1500_v24, %v150_v19  ;;  %v406_v36 = vsel %vm405_vm7, %v1530_v42, %v1537_v49  ;;  %v407_v37 = vsel %vm405_vm7, %v1537_v49, %v1530_v42  ;;  %v1672_v57 = vld [vmem:[%s2313_s6 + $0x1] ss:$2 sm:$0x3]  ;;  %s1350_s6 = smov 3  }
  0x9d   :  { %v1567_v62 = vadd.f32 %v1500_v24, %v149_v60  ;;  %v1632_v43 = vsel %vm418_vm8, %v406_v36, 0.0  ;;  %v1634_v44 = vsel %vm419_vm9, %v407_v37, 0.0  ;;  %vm305_vm7 = vcmp.ge.s32.totalorder %v1672_v57, 1 }
  0x9e   :  { %2323 = vst [vmem:[#allocation3_spill] sm:$0xff] %v1570_v63  ;;  %v164_v8 = vmul.f32 %v1570_v63, %v1570_v63  ;;  %vm341_vm8 = vcmp.lt.s32.totalorder %v1672_v57, 15  ;;  %vm1033_vm9 = vcmp.lt.s32.totalorder %v1509_v28, 80 }
  0x9f   :  { %v1544_v61 = vpop.permute.xlu1 %591  ;;  %2322 = vst [vmem:[#allocation2_spill] sm:$0xff] %v1567_v62  ;;  %v160_v4 = vadd.f32 %v1570_v63, %v1567_v62  ;;  %v163_v5 = vmul.f32 %v1567_v62, %v1567_v62 }
  0xa1   :  { %v165_v16 = vadd.f32 %v164_v8, %v163_v5  ;;  %v306_v5 = vsel %vm305_vm7, 1, %v2317_v1  ;;  %v1045_v8 = vrot.slane %v1037_v20, %v1507_v27  ;;  %vm933_vm7 = vcmp.ge.s32.totalorder %v1672_v57, 3 }
  0xa2   :  { %v310_v25 = vrot.slane %v306_v5, %v1504_v26 }
  0xa3   :  { %v1550_v31 = vpop.permute.xlu1 %593 }
  0xa4   :  { %v596_v42 = vsel %vm595_vm10, %v1544_v61, %v1550_v31  ;;  %v597_v49 = vsel %vm595_vm10, %v1550_v31, %v1544_v61 }
  0xa7   :  { %v1554_v50 = vpop.permute.xlu1 %715 }
  0xab   :  { %v1558_v54 = vpop.permute.xlu1 %905 }
  0xaf   :  { %v1562_v59 = vpop.permute.xlu1 %1029 }
  0xb3   :  { %v328_v2 = vpop.permute.xlu1 %327 }
  0xb4   :  { %v1573_v22 = vmul.f32 %v328_v2, %v1516_v38  ;;  %v1576_v3 = vmul.f32 %v328_v2, %v1518_v39  ;;  %v1348_v39 = vmov 8  }
  0xb7   :  { %v1586_v24 = vpop.permute.xlu1 %363 }
  0xb9   :  { %161 = vadd.xlane.f32.xlu0 %v160_v4 }
  0xbb   :  { %v1591_v38 = vpop.permute.xlu1 %372 }
  0xbe   :  { %166 = vadd.xlane.f32.xlu1 %v165_v16 }
  0xc0   :  { %v1596_v21 = vpop.permute.xlu1 %431 }
  0xcf   :  { %1059 = vperm.xlu1 %1279, %v1454_v14   ;;  %394 = vperm.xlu0 %1281, %v1435_v11  }
  0xd3   :  { %1280 = vset.pattern.permute.xlu1 %v1345_v17  ;;  %708 = vperm.xlu0 %1281, %v1442_v12   ;;  %v1603_v17 = vpop.permute.xlu1 %437 }
  0xd4   :  { %1065 = vperm.xlu1 %1280, %v1454_v14  }
  0xd7   :  { %1284 = vset.pattern.permute.xlu0 %v1332_v0  ;;  %v1611_v29 = vpop.permute.xlu1 %641 }
  0xd8   :  { %1282 = vset.pattern.permute.xlu1 %v1348_v39  ;;  %356 = vperm.xlu0 %1284, %v1435_v11  }
  0xd9   :  { %453 = vperm.xlu1 %1282, %v1435_v11  }
  0xdc   :  { %984 = vperm.xlu0 %1284, %v1454_v14  }
  0xdd   :  { %1283 = vset.pattern.permute.xlu1 %v1332_v0  ;;  %v718_v0 = vpop.permute.xlu0 %717 }
  0xde   :  { %670 = vperm.xlu1 %1283, %v1442_v12   ;;  %v720_v53 = vsel %vm719_vm15, %v1554_v50, %v718_v0  ;;  %v721_v55 = vsel %vm719_vm15, %v718_v0, %v1554_v50  ;;  %v314_v0 = vrot.slane %v306_v5, %v1507_v27  ;;  %vm338_vm15 = vcmp.lt.s32.totalorder %v1509_v28, 127  ;;  %v1236_v5 = vld [vmem:[%s2310_s3 + $0x18] sm:$0xff] }
  0xe0   :  { %1286 = vset.pattern.permute.xlu0 %v2317_v1  ;;  %vm1719_vm14 = vcmp.eq.s32.totalorder %v314_v0, 1 }
  0xe1   :  { %321 = vperm.xlu0 %1286, %v1435_v11   ;;  %v599_v11 = vsel %vm598_vm6, 1, %v2317_v1  ;;  %v908_v35 = vpop.permute.xlu0 %907  ;;  %vm923_vm6 = vcmp.eq.s32.totalorder %v921_v56, 1 }
  0xe2   :  { %1285 = vset.pattern.permute.xlu1 %v1348_v39  ;;  %v607_v34 = vrot.slane %v599_v11, %v1507_v27  ;;  %v910_v41 = vsel %vm909_vm2, %v1558_v54, %v908_v35  ;;  %v911_v60 = vsel %vm909_vm2, %v908_v35, %v1558_v54  ;;  %v1041_v54 = vrot.slane %v1037_v20, %v1504_v26 }
  0xe3   :  { %767 = vperm.xlu1 %1285, %v1442_v12   ;;  %v1690_v2 = vsel %vm922_vm5, %v911_v60, 0.0  ;;  %v1692_v4 = vsel %vm923_vm6, %v910_v41, 0.0  ;;  %vm619_vm2 = vcmp.ge.s32.totalorder %v1672_v57, 2 }
  0xe4   :  { %vm609_vm13 = vcmp.eq.s32.totalorder %v607_v34, 1  ;;  %vm1046_vm10 = vcmp.eq.s32.totalorder %v1041_v54, 1 }
  0xe5   :  { %635 = vperm.xlu0 %1286, %v1442_v12   ;;  %v603_v12 = vrot.slane %v599_v11, %v1504_v26  ;;  %v1032_v45 = vpop.permute.xlu0 %1031  ;;  %v1651_v32 = vsel %vm609_vm13, %v596_v42, 0.0  ;;  %v342_v11 = vsel %vm341_vm8, 1, %v2317_v1  ;;  %vm1715_vm13 = vcmp.eq.s32.totalorder %v310_v25, 1 }
  0xe6   :  { %v1034_v30 = vsel %vm1033_vm9, %v1562_v59, %v1032_v45  ;;  %v1035_v33 = vsel %vm1033_vm9, %v1032_v45, %v1562_v59  ;;  %v350_v34 = vrot.slane %v342_v11, %v1507_v27  ;;  %vm930_vm8 = vcmp.lt.s32.totalorder %v1509_v28, 3 }
  0xe7   :  { %1287 = vset.pattern.permute.xlu1 %v1346_v18  ;;  %v1621_v18 = vpop.permute.xlu1 %686  ;;  %vm608_vm12 = vcmp.eq.s32.totalorder %v603_v12, 1  ;;  %v346_v12 = vrot.slane %v342_v11, %v1504_v26  ;;  %v1723_v42 = vsel %vm1046_vm10, %v1034_v30, 0.0 }
  0xe8   :  { %1022 = vperm.xlu1 %1287, %v1454_v14   ;;  %v1649_v47 = vsel %vm608_vm12, %v597_v49, 0.0  ;;  %vm302_vm12 = vcmp.lt.s32.totalorder %v1509_v28, 1 }
  0xe9   :  { %949 = vperm.xlu0 %1286, %v1454_v14   ;;  %v1659_v48 = vpop.permute.xlu0 %378 }
  0xeb   :  { %v1646_v46 = vpop.permute.xlu1 %745 }
  0xec   :  { %1288 = vset.pattern.permute.xlu1 %v1348_v39 }
  0xed   :  { %1081 = vperm.xlu1 %1288, %v1454_v14   ;;  %365 = vrot.lane.b32.xlu0 %v1427_v10, %s1343_s2  ;;  %v723_v14 = vsel %vm722_vm11, 1, %v2317_v1  ;;  %v1680_v50 = vpop.permute.xlu0 %692  ;;  %vm1047_vm11 = vcmp.eq.s32.totalorder %v1045_v8, 1 }
  0xee   :  { %v727_v61 = vrot.slane %v723_v14, %v1504_v26  ;;  %v731_v31 = vrot.slane %v723_v14, %v1507_v27  ;;  %v1725_v49 = vsel %vm1047_vm11, %v1035_v33, 0.0  ;;  %vm655_vm11 = vcmp.lt.s32.totalorder %v1672_v57, 14 }
  0xef   :  { %v1662_v52 = vpop.permute.xlu1 %751 }
  0xf0   :  { %vm732_vm0 = vcmp.eq.s32.totalorder %v727_v61, 1  ;;  %vm733_vm1 = vcmp.eq.s32.totalorder %v731_v31, 1  ;;  %v1220_v61 = vld [vmem:[%s2310_s3 + $0x8] sm:$0xff]  ;;  %v1228_v31 = vld [vmem:[%s2310_s3 + $0x10] sm:$0xff]  ;;  %s1351_s3 = smov 126  }
  0xf1   :  { %422 = vrot.lane.b32.xlu1 %v1632_v43, %s1343_s2  ;;  %424 = vrot.lane.b32.xlu0 %v1634_v44, %s1343_s2  ;;  %v1676_v58 = vsel %vm732_vm0, %v720_v53, 0.0  ;;  %v1678_v40 = vsel %vm733_vm1, %v721_v55, 0.0  ;;  %v1701_v16 = vpop.permute.xlu0 %1006  ;;  %vm1750_vm0 = vcmp.eq.s32.totalorder %v346_v12, 1  ;;  %vm1754_vm1 = vcmp.eq.s32.totalorder %v350_v34, 1 }
  0xf2   :  { %1289 = vset.pattern.permute.xlu1 %v2317_v1  ;;  %2324 = vst [vmem:[#allocation4_spill] sm:$0xff] %v1701_v16 }
  0xf3   :  { %v1687_v19 = vpop.permute.xlu1 %955 }
  0xf5   :  { %612 = vrot.lane.b32.xlu1 %v1649_v47, %s1349_s11  ;;  %614 = vrot.lane.b32.xlu0 %v1651_v32, %s1349_s11 }
  0xf7   :  { %v1703_v39 = vpop.permute.xlu1 %1000 }
  0xf9   :  { %677 = vrot.lane.b32.xlu1 %v1449_v13, %s1349_s11  ;;  %679 = vrot.lane.b32.xlu0 %v1407_v6, %s1349_s11 }
  0xfd   :  { %736 = vrot.lane.b32.xlu1 %v1676_v58, %s1349_s11  ;;  %738 = vrot.lane.b32.xlu0 %v1678_v40, %s1349_s11 }
 0x101   :  { %926 = vrot.lane.b32.xlu1 %v1690_v2, %s1350_s6  ;;  %928 = vrot.lane.b32.xlu0 %v1692_v4, %s1350_s6 }
 0x105   :  { %991 = vrot.lane.b32.xlu1 %v1464_v15, %s1350_s6  ;;  %993 = vrot.lane.b32.xlu0 %v1415_v7, %s1350_s6 }
 0x108   :  { %v299_v59 = vpop.permute.xlu0 %298  ;;  %v301_v37 = vpop.permute.xlu1 %300 }
 0x109   :  { %v1729_v14 = vsel %vm302_vm12, %v299_v59, %v301_v37  ;;  %v1733_v45 = vsel %vm302_vm12, %v301_v37, %v299_v59  ;;  %1050 = vrot.lane.b32.xlu1 %v1723_v42, %s1350_s6  ;;  %1052 = vrot.lane.b32.xlu0 %v1725_v49, %s1350_s6 }
 0x10a   :  { %v317_v23 = vsel %vm1715_vm13, %v1733_v45, 0.0  ;;  %v318_v51 = vsel %vm1719_vm14, %v1729_v14, 0.0 }
 0x10c   :  { %v335_v56 = vpop.permute.xlu0 %334  ;;  %v337_v41 = vpop.permute.xlu1 %336 }
 0x10d   :  { %v339_v60 = vsel %vm338_vm15, %v335_v56, %v337_v41  ;;  %v340_v20 = vsel %vm338_vm15, %v337_v41, %v335_v56  ;;  %464 = vperm.xlu1 %1289, %v1220_v61   ;;  %778 = vperm.xlu0 %1286, %v1228_v31  }
 0x10e   :  { %v353_v54 = vsel %vm1750_vm0, %v339_v60, 0.0  ;;  %v354_v8 = vsel %vm1754_vm1, %v340_v20, 0.0 }
 0x111   :  { %1092 = vperm.xlu1 %1289, %v1236_v5   ;;  %387 = vrot.lane.b32.xlu0 %v1427_v10, %s1347_s10 }
 0x115   :  { %385 = vrot.lane.b32.xlu1 %v1420_v9, %s1347_s10  ;;  %446 = vrot.lane.b32.xlu0 %v1634_v44, %s1347_s10 }
 0x119   :  { %444 = vrot.lane.b32.xlu1 %v1632_v43, %s1347_s10  ;;  %650 = vrot.lane.b32.xlu0 %v1651_v32, %s1351_s3 }
 0x11d   :  { %648 = vrot.lane.b32.xlu1 %v1649_v47, %s1351_s3  ;;  %701 = vrot.lane.b32.xlu0 %v1407_v6, %s1351_s3 }
 0x121   :  { %699 = vrot.lane.b32.xlu1 %v1449_v13, %s1351_s3  ;;  %760 = vrot.lane.b32.xlu0 %v1678_v40, %s1351_s3 }
 0x125   :  { %758 = vrot.lane.b32.xlu1 %v1676_v58, %s1351_s3  ;;  %964 = vrot.lane.b32.xlu0 %v1692_v4, %s1352_s20 }
 0x129   :  { %962 = vrot.lane.b32.xlu1 %v1690_v2, %s1352_s20  ;;  %1015 = vrot.lane.b32.xlu0 %v1415_v7, %s1352_s20 }
 0x12d   :  { %1013 = vrot.lane.b32.xlu1 %v1464_v15, %s1352_s20  ;;  %1074 = vrot.lane.b32.xlu0 %v1725_v49, %s1352_s20 }
 0x131   :  { %1072 = vrot.lane.b32.xlu1 %v1723_v42, %s1352_s20 }
 0x146   :  { %v162_v25 = vpop.xlane.xlu0 %161 }
 0x147   :  { %v169_v0 = vrot.slane %v162_v25, 4 }
 0x149   :  { %v171_v11 = vadd.f32 %v169_v0, %v162_v25  ;;  %v158_v0 = vld [vmem:[%s2314_s4] sm:$0xf] }
 0x14b   :  { %v167_v30 = vpop.xlane.xlu1 %166  ;;  %v176_v33 = vmul.f32 0.001953125, %v171_v11 }
 0x14c   :  { %v173_v12 = vrot.slane %v167_v30, 4 }
 0x14d   :  { %v178_v14 = vmul.f32 %v176_v33, %v176_v33 }
 0x14e   :  { %v175_v34 = vadd.f32 %v173_v12, %v167_v30  ;;  %v1789_v59 = vpop.permute.xlu0 %394 }
 0x14f   :  { %v1791_v37 = vpop.permute.xlu1 %1059 }
 0x150   :  { %v177_v45 = vmul.f32 0.001953125, %v175_v34 }
 0x152   :  { %v179_v7 = vsub.f32 %v177_v45, %v178_v14  ;;  %v1793_v61 = vpop.permute.xlu0 %708 }
 0x153   :  { %v1795_v15 = vpop.permute.xlu1 %1065 }
 0x154   :  { %v180_v31 = vmax.f32 %v179_v7, 0.0 }
 0x156   :  { %v181_v56 = vadd.f32 1e-05, %v180_v31 }
 0x157   :  { %v357_v41 = vpop.permute.xlu0 %356 }
 0x158   :  { %1290 = vrsqrt.f32 %v181_v56  ;;  %v1797_v60 = vpop.permute.xlu1 %453  ;;  %v359_v34 = vmul.f32 %v357_v41, %v353_v54  ;;  %v360_v45 = vmul.f32 %v357_v41, %v354_v8 }
 0x15b   :  { %v1799_v20 = vpop.permute.xlu0 %984 }
 0x15d   :  { %v1801_v5 = vpop.permute.xlu1 %670 }
 0x160   :  { %v322_v25 = vpop.permute.xlu0 %321 }
 0x161   :  { %v324_v11 = vmul.f32 %v322_v25, %v317_v23  ;;  %v325_v30 = vmul.f32 %v322_v25, %v318_v51  ;;  %v381_v25 = vmul.f32 %v1420_v9, %v1659_v48  ;;  %v440_v9 = vmul.f32 %v1603_v17, %v1632_v43 }
 0x162   :  { %v1291_v12 = vpop.eup %1290  ;;  %v1806_v14 = vpop.permute.xlu1 %767 }
 0x163   :  { %v332_v7 = vadd.f32 %v1573_v22, %v324_v11  ;;  %v333_v31 = vadd.f32 %v1576_v3, %v325_v30  ;;  %v1810_v56 = vmul.f32 %v1291_v12, %v158_v0  ;;  %v2333_v3 = vmov 0  }
 0x164   :  { %v636_v1 = vpop.permute.xlu0 %635  ;;  %v620_v8 = vsel %vm619_vm2, 1, %v2333_v3  ;;  %v382_v0 = vmul.f32 %v1427_v10, %v1659_v48 }
 0x165   :  { %v1812_v63 = vadd.f32 %v359_v34, %v332_v7  ;;  %v1814_v62 = vadd.f32 %v360_v45, %v333_v31  ;;  %v1817_v16 = vmul.f32 %v1810_v56, %v176_v33  ;;  %v624_v45 = vrot.slane %v620_v8, %v1504_v26 }
 0x167   :  { %v1819_v23 = vpop.permute.xlu1 %1022  ;;  %vm1864_vm5 = vcmp.eq.s32.totalorder %v624_v45, 1  ;;  %v644_v45 = vmul.f32 %v1611_v29, %v1649_v47  ;;  %v695_v47 = vmul.f32 %v1449_v13, %v1680_v50  ;;  %v754_v13 = vmul.f32 %v1662_v52, %v1676_v58 }
 0x168   :  { %v1821_v51 = vpop.permute.xlu0 %949 }
 0x16c   :  { %v1824_v54 = vpop.permute.xlu1 %1081  ;;  %v366_v22 = vpop.permute.xlu0 %365 }
 0x16d   :  { %v367_v41 = vsel %vm302_vm12, %v1586_v24, %v366_v22  ;;  %v368_v33 = vsel %vm302_vm12, %v366_v22, %v1586_v24  ;;  %v628_v24 = vrot.slane %v620_v8, %v1507_v27 }
 0x16e   :  { %v369_v11 = vsel %vm1715_vm13, %v368_v33, 0.0  ;;  %v370_v30 = vsel %vm1719_vm14, %v367_v41, 0.0 }
 0x16f   :  { %v375_v12 = vmul.f32 %v1591_v38, %v369_v11  ;;  %v376_v34 = vmul.f32 %v1591_v38, %v370_v30  ;;  %v441_v38 = vmul.f32 %v1603_v17, %v1634_v44  ;;  %vm1868_vm6 = vcmp.eq.s32.totalorder %v628_v24, 1 }
 0x170   :  { %v423_v7 = vpop.permute.xlu1 %422  ;;  %v425_v31 = vpop.permute.xlu0 %424  ;;  %v645_v24 = vmul.f32 %v1611_v29, %v1651_v32 }
 0x171   :  { %v1847_v10 = vadd.f32 %v381_v25, %v375_v12  ;;  %v1849_v48 = vadd.f32 %v382_v0, %v376_v34  ;;  %v426_v22 = vsel %vm302_vm12, %v423_v7, %v425_v31  ;;  %v427_v41 = vsel %vm302_vm12, %v425_v31, %v423_v7 }
 0x172   :  { %v428_v8 = vsel %vm1715_vm13, %v427_v41, 0.0  ;;  %v429_v43 = vsel %vm1719_vm14, %v426_v22, 0.0  ;;  %v934_v41 = vsel %vm933_vm7, 1, %v2333_v3  ;;  %vm969_vm12 = vcmp.lt.s32.totalorder %v1672_v57, 13 }
 0x173   :  { %v434_v33 = vmul.f32 %v1596_v21, %v428_v8  ;;  %v435_v25 = vmul.f32 %v1596_v21, %v429_v43  ;;  %vm652_vm13 = vcmp.lt.s32.totalorder %v1509_v28, 126  ;;  %v970_v57 = vsel %vm969_vm12, 1, %v2333_v3 }
 0x174   :  { %v613_v17 = vpop.permute.xlu1 %612  ;;  %v615_v44 = vpop.permute.xlu0 %614  ;;  %v974_v55 = vrot.slane %v970_v57, %v1504_v26 }
 0x175   :  { %v1873_v35 = vadd.f32 %v440_v9, %v434_v33  ;;  %v1875_v36 = vadd.f32 %v441_v38, %v435_v25  ;;  %v617_v30 = vsel %vm616_vm3, %v613_v17, %v615_v44  ;;  %v618_v21 = vsel %vm616_vm3, %v615_v44, %v613_v17 }
 0x176   :  { %v631_v12 = vsel %vm1864_vm5, %v618_v21, 0.0  ;;  %v632_v34 = vsel %vm1868_vm6, %v617_v30, 0.0  ;;  %v938_v44 = vrot.slane %v934_v41, %v1504_v26  ;;  %v942_v30 = vrot.slane %v934_v41, %v1507_v27 }
 0x177   :  { %v638_v9 = vmul.f32 %v636_v1, %v631_v12  ;;  %v639_v7 = vmul.f32 %v636_v1, %v632_v34  ;;  %v696_v1 = vmul.f32 %v1407_v6, %v1680_v50 }
 0x178   :  { %v678_v31 = vpop.permute.xlu1 %677  ;;  %v680_v22 = vpop.permute.xlu0 %679  ;;  %vm1929_vm9 = vcmp.eq.s32.totalorder %v938_v44, 1  ;;  %vm1933_vm10 = vcmp.eq.s32.totalorder %v942_v30, 1 }
 0x179   :  { %v1890_v38 = vadd.f32 %v644_v45, %v638_v9  ;;  %v1892_v8 = vadd.f32 %v645_v24, %v639_v7  ;;  %v681_v43 = vsel %vm616_vm3, %v678_v31, %v680_v22  ;;  %v682_v33 = vsel %vm616_vm3, %v680_v22, %v678_v31 }
 0x17a   :  { %v683_v29 = vsel %vm1864_vm5, %v682_v33, 0.0  ;;  %v684_v32 = vsel %vm1868_vm6, %v681_v43, 0.0 }
 0x17b   :  { %v689_v25 = vmul.f32 %v1621_v18, %v683_v29  ;;  %v690_v17 = vmul.f32 %v1621_v18, %v684_v32  ;;  %v755_v18 = vmul.f32 %v1662_v52, %v1678_v40 }
 0x17c   :  { %v737_v21 = vpop.permute.xlu1 %736  ;;  %v739_v12 = vpop.permute.xlu0 %738 }
 0x17d   :  { %v1912_v6 = vadd.f32 %v695_v47, %v689_v25  ;;  %v1914_v50 = vadd.f32 %v696_v1, %v690_v17  ;;  %v740_v34 = vsel %vm616_vm3, %v737_v21, %v739_v12  ;;  %v741_v45 = vsel %vm616_vm3, %v739_v12, %v737_v21 }
 0x17e   :  { %v742_v24 = vsel %vm1864_vm5, %v741_v45, 0.0  ;;  %v743_v58 = vsel %vm1868_vm6, %v740_v34, 0.0  ;;  %v958_v47 = vmul.f32 %v1687_v19, %v1690_v2  ;;  %v959_v1 = vmul.f32 %v1687_v19, %v1692_v4 }
 0x17f   :  { %v748_v9 = vmul.f32 %v1646_v46, %v742_v24  ;;  %v749_v7 = vmul.f32 %v1646_v46, %v743_v58  ;;  %v1068_v12 = vmul.f32 %v1795_v15, %v1723_v42  ;;  %v1069_v34 = vmul.f32 %v1795_v15, %v1725_v49 }
 0x180   :  { %v927_v52 = vpop.permute.xlu1 %926  ;;  %v929_v40 = vpop.permute.xlu0 %928  ;;  %v656_v42 = vsel %vm655_vm11, 1, %v2333_v3 }
 0x181   :  { %v1937_v0 = vadd.f32 %v754_v13, %v748_v9  ;;  %v1939_v11 = vadd.f32 %v755_v18, %v749_v7  ;;  %v931_v41 = vsel %vm930_vm8, %v927_v52, %v929_v40  ;;  %v932_v46 = vsel %vm930_vm8, %v929_v40, %v927_v52 }
 0x182   :  { %v945_v43 = vsel %vm1929_vm9, %v932_v46, 0.0  ;;  %v946_v33 = vsel %vm1933_vm10, %v931_v41, 0.0 }
 0x183   :  { %v952_v29 = vmul.f32 %v1821_v51, %v945_v43  ;;  %v953_v32 = vmul.f32 %v1821_v51, %v946_v33  ;;  %v660_v33 = vrot.slane %v656_v42, %v1504_v26 }
 0x184   :  { %v1955_v25 = vpop.permute.xlu1 %991  ;;  %v1957_v17 = vpop.permute.xlu0 %993 }
 0x185   :  { %v1959_v44 = vadd.f32 %v958_v47, %v952_v29  ;;  %v1961_v30 = vadd.f32 %v959_v1, %v953_v32  ;;  %v664_v47 = vrot.slane %v656_v42, %v1507_v27  ;;  %vm2012_vm14 = vcmp.eq.s32.totalorder %v660_v33, 1 }
 0x187   :  { %vm2016_vm2 = vcmp.eq.s32.totalorder %v664_v47, 1 }
 0x188   :  { %v1051_v13 = vpop.permute.xlu1 %1050  ;;  %v1053_v21 = vpop.permute.xlu0 %1052 }
 0x189   :  { %v1054_v2 = vsel %vm930_vm8, %v1051_v13, %v1053_v21  ;;  %v1055_v19 = vsel %vm930_vm8, %v1053_v21, %v1051_v13 }
 0x18a   :  { %v1056_v4 = vsel %vm1929_vm9, %v1055_v19, 0.0  ;;  %v1057_v51 = vsel %vm1933_vm10, %v1054_v2, 0.0 }
 0x18b   :  { %v1062_v45 = vmul.f32 %v1791_v37, %v1056_v4  ;;  %v1063_v18 = vmul.f32 %v1791_v37, %v1057_v51 }
 0x18c   :  { %v465_v24 = vpop.permute.xlu1 %464  ;;  %v1977_v58 = vpop.permute.xlu0 %778 }
 0x18d   :  { %v1979_v9 = vadd.f32 %v1068_v12, %v1062_v45  ;;  %v1981_v7 = vadd.f32 %v1069_v34, %v1063_v18 }
 0x190   :  { %v1983_v52 = vpop.permute.xlu1 %1092  ;;  %v388_v40 = vpop.permute.xlu0 %387 }
 0x194   :  { %v386_v41 = vpop.permute.xlu1 %385  ;;  %v447_v49 = vpop.permute.xlu0 %446 }
 0x195   :  { %v389_v15 = vsel %vm338_vm15, %v386_v41, %v388_v40  ;;  %v390_v37 = vsel %vm338_vm15, %v388_v40, %v386_v41 }
 0x196   :  { %v391_v46 = vsel %vm1750_vm0, %v389_v15, 0.0  ;;  %v392_v43 = vsel %vm1754_vm1, %v390_v37, 0.0 }
 0x197   :  { %v397_v1 = vmul.f32 %v1789_v59, %v391_v46  ;;  %v398_v29 = vmul.f32 %v1789_v59, %v392_v43  ;;  %v978_v46 = vrot.slane %v970_v57, %v1507_v27 }
 0x198   :  { %v445_v32 = vpop.permute.xlu1 %444  ;;  %v651_v13 = vpop.permute.xlu0 %650 }
 0x199   :  { %v399_v21 = vadd.f32 %v397_v1, %v1847_v10  ;;  %v400_v2 = vadd.f32 %v398_v29, %v1849_v48  ;;  %v448_v19 = vsel %vm338_vm15, %v445_v32, %v447_v49  ;;  %v449_v4 = vsel %vm338_vm15, %v447_v49, %v445_v32 }
 0x19a   :  { %v450_v51 = vsel %vm1750_vm0, %v448_v19, 0.0  ;;  %v451_v59 = vsel %vm1754_vm1, %v449_v4, 0.0  ;;  %vm966_vm15 = vcmp.lt.s32.totalorder %v1509_v28, 125  ;;  %vm2039_vm0 = vcmp.eq.s32.totalorder %v974_v55, 1 }
 0x19b   :  { %v460_v10 = vadd.f32 %v399_v21, %v1812_v63  ;;  %v461_v48 = vadd.f32 %v400_v2, %v1814_v62  ;;  %v456_v34 = vmul.f32 %v1797_v60, %v450_v51  ;;  %v457_v53 = vmul.f32 %v1797_v60, %v451_v59 }
 0x19c   :  { %v649_v45 = vpop.permute.xlu1 %648  ;;  %v702_v18 = vpop.permute.xlu0 %701  ;;  %vm2069_vm1 = vcmp.eq.s32.totalorder %v978_v46, 1 }
 0x19d   :  { %v458_v40 = vadd.f32 %v456_v34, %v1873_v35  ;;  %v459_v42 = vadd.f32 %v457_v53, %v1875_v36  ;;  %v653_v41 = vsel %vm652_vm13, %v649_v45, %v651_v13  ;;  %v654_v63 = vsel %vm652_vm13, %v651_v13, %v649_v45 }
 0x19e   :  { %v667_v62 = vsel %vm2012_vm14, %v653_v41, 0.0  ;;  %v668_v60 = vsel %vm2016_vm2, %v654_v63, 0.0 }
 0x19f   :  { %v467_v49 = vadd.f32 %v465_v24, %v458_v40  ;;  %v468_v15 = vadd.f32 %v465_v24, %v459_v42  ;;  %v673_v26 = vmul.f32 %v1801_v5, %v667_v62  ;;  %v674_v35 = vmul.f32 %v1801_v5, %v668_v60 }
 0x1a0   :  { %v700_v37 = vpop.permute.xlu1 %699  ;;  %v761_v36 = vpop.permute.xlu0 %760 }
 0x1a1   :  { %v675_v33 = vadd.f32 %v673_v26, %v1890_v38  ;;  %v676_v47 = vadd.f32 %v674_v35, %v1892_v8  ;;  %v703_v24 = vsel %vm652_vm13, %v700_v37, %v702_v18  ;;  %v704_v5 = vsel %vm652_vm13, %v702_v18, %v700_v37  ;;  %v2350_v26 = vld [vmem:[#allocation4_spill] sm:$0xff]  ;;  %v1331_v37 = vld [vmem:[%s2311_s0 + $0x38] sm:$0xff] }
 0x1a2   :  { %v705_v1 = vsel %vm2012_vm14, %v703_v24, 0.0  ;;  %v706_v27 = vsel %vm2016_vm2, %v704_v5, 0.0  ;;  %v2053_v29 = vadd.f32 %v467_v49, %v460_v10  ;;  %v2055_v32 = vadd.f32 %v468_v15, %v461_v48 }
 0x1a3   :  { %v995_v38 = vsel %vm930_vm8, %v1955_v25, %v1957_v17  ;;  %v996_v8 = vsel %vm930_vm8, %v1957_v17, %v1955_v25  ;;  %v711_v13 = vmul.f32 %v1793_v61, %v705_v1  ;;  %v712_v57 = vmul.f32 %v1793_v61, %v706_v27 }
 0x1a4   :  { %v759_v21 = vpop.permute.xlu1 %758  ;;  %v965_v2 = vpop.permute.xlu0 %964  ;;  %v475_v19 = vadd.f32 %v2055_v32, %v2053_v29  ;;  %v478_v51 = vmul.f32 %v2053_v29, %v2053_v29  ;;  %v479_v59 = vmul.f32 %v2055_v32, %v2055_v32  ;;  %v997_v48 = vsel %vm1929_vm9, %v996_v8, 0.0 }
 0x1a5   :  { %v713_v25 = vadd.f32 %v711_v13, %v1912_v6  ;;  %v714_v17 = vadd.f32 %v712_v57, %v1914_v50  ;;  %v762_v61 = vsel %vm652_vm13, %v759_v21, %v761_v36  ;;  %v763_v10 = vsel %vm652_vm13, %v761_v36, %v759_v21 }
 0x1a6   :  { %v998_v34 = vsel %vm1933_vm10, %v995_v38, 0.0  ;;  %v764_v53 = vsel %vm2012_vm14, %v762_v61, 0.0  ;;  %v765_v6 = vsel %vm2016_vm2, %v763_v10, 0.0  ;;  %476 = vadd.xlane.f32.xlu1 %v475_v19  ;;  %v480_v42 = vadd.f32 %v479_v59, %v478_v51 }
 0x1a7   :  { %v774_v50 = vadd.f32 %v713_v25, %v675_v33  ;;  %v775_v45 = vadd.f32 %v714_v17, %v676_v47  ;;  %v770_v18 = vmul.f32 %v1806_v14, %v764_v53  ;;  %v771_v55 = vmul.f32 %v1806_v14, %v765_v6 }
 0x1a8   :  { %v963_v40 = vpop.permute.xlu1 %962  ;;  %v1003_v41 = vmul.f32 %v1703_v39, %v997_v48  ;;  %v1004_v63 = vmul.f32 %v1703_v39, %v998_v34  ;;  %v1016_v60 = vpop.permute.xlu0 %1015  ;;  %v1330_v39 = vld [vmem:[%s2311_s0 + $0x30] sm:$0xff]  ;;  %v1010_v36 = vmul.f32 %v1331_v37, %v2350_v26 }
 0x1a9   :  { %v772_v31 = vadd.f32 %v770_v18, %v1937_v0  ;;  %v773_v22 = vadd.f32 %v771_v55, %v1939_v11  ;;  %v967_v12 = vsel %vm966_vm15, %v963_v40, %v965_v2  ;;  %v968_v3 = vsel %vm966_vm15, %v965_v2, %v963_v40  ;;  %v159_v55 = vld [vmem:[%s2315_s5] sm:$0xf] }
 0x1aa   :  { %v981_v62 = vsel %vm2039_vm0, %v967_v12, 0.0  ;;  %v982_v14 = vsel %vm2069_vm1, %v968_v3, 0.0  ;;  %481 = vadd.xlane.f32.xlu1 %v480_v42  ;;  %v1009_v35 = vmul.f32 %v1330_v39, %v2350_v26  ;;  %v185_v40 = vsub.f32 %v159_v55, %v1817_v16 }
 0x1ab   :  { %v781_v0 = vadd.f32 %v1977_v58, %v772_v31  ;;  %v782_v11 = vadd.f32 %v1977_v58, %v773_v22  ;;  %v987_v49 = vmul.f32 %v1799_v20, %v981_v62  ;;  %v988_v15 = vmul.f32 %v1799_v20, %v982_v14 }
 0x1ac   :  { %v1014_v46 = vpop.permute.xlu1 %1013  ;;  %v1011_v38 = vadd.f32 %v1009_v35, %v1003_v41  ;;  %v1075_v13 = vpop.permute.xlu0 %1074  ;;  %v191_v42 = vrot.slane %v185_v40, 4  ;;  %v187_v22 = vrot.slane %v1810_v56, 4 }
 0x1ad   :  { %v989_v33 = vadd.f32 %v987_v49, %v1959_v44  ;;  %v990_v58 = vadd.f32 %v988_v15, %v1961_v30  ;;  %v1017_v20 = vsel %vm966_vm15, %v1014_v46, %v1016_v60  ;;  %v1018_v47 = vsel %vm966_vm15, %v1016_v60, %v1014_v46 }
 0x1ae   :  { %v1019_v24 = vsel %vm2039_vm0, %v1017_v20, 0.0  ;;  %v1020_v5 = vsel %vm2069_vm1, %v1018_v47, 0.0  ;;  %v2127_v1 = vadd.f32 %v781_v0, %v774_v50  ;;  %v2129_v27 = vadd.f32 %v782_v11, %v775_v45 }
 0x1af   :  { %v1012_v44 = vadd.f32 %v1010_v36, %v1004_v63  ;;  %v1025_v30 = vmul.f32 %v1819_v23, %v1019_v24  ;;  %v1026_v8 = vmul.f32 %v1819_v23, %v1020_v5  ;;  %v193_v31 = vsel %vm148_vm4, %v185_v40, %v191_v42 }
 0x1b0   :  { %v1073_v57 = vpop.permute.xlu1 %1072  ;;  %v789_v21 = vadd.f32 %v2129_v27, %v2127_v1  ;;  %v792_v4 = vmul.f32 %v2127_v1, %v2127_v1  ;;  %v189_v12 = vsel %vm148_vm4, %v1810_v56, %v187_v22 }
 0x1b1   :  { %v1027_v2 = vadd.f32 %v1025_v30, %v1011_v38  ;;  %v1028_v19 = vadd.f32 %v1026_v8, %v1012_v44  ;;  %v1076_v51 = vsel %vm966_vm15, %v1073_v57, %v1075_v13  ;;  %v1077_v59 = vsel %vm966_vm15, %v1075_v13, %v1073_v57 }
 0x1b2   :  { %v1078_v25 = vsel %vm2039_vm0, %v1076_v51, 0.0  ;;  %v1079_v17 = vsel %vm2069_vm1, %v1077_v59, 0.0  ;;  %790 = vadd.xlane.f32.xlu0 %v789_v21 }
 0x1b3   :  { %v1088_v23 = vadd.f32 %v1027_v2, %v989_v33  ;;  %v1089_v61 = vadd.f32 %v1028_v19, %v990_v58  ;;  %v1084_v10 = vmul.f32 %v1824_v54, %v1078_v25  ;;  %v1085_v48 = vmul.f32 %v1824_v54, %v1079_v17  ;;  %v1221_v33 = vld [vmem:[%s2314_s4 + $0x4] sm:$0xf] }
 0x1b4   :  { %v1222_v19 = vld [vmem:[%s2315_s5 + $0x4] sm:$0xf] }
 0x1b5   :  { %v1086_v34 = vadd.f32 %v1084_v10, %v1979_v9  ;;  %v1087_v53 = vadd.f32 %v1085_v48, %v1981_v7  ;;  %v793_v7 = vmul.f32 %v2129_v27, %v2129_v27 }
 0x1b7   :  { %v1095_v28 = vadd.f32 %v1983_v52, %v1086_v34  ;;  %v1096_v6 = vadd.f32 %v1983_v52, %v1087_v53  ;;  %v794_v18 = vadd.f32 %v793_v7, %v792_v4  ;;  %v2351_v4 = vld [vmem:[#allocation2_spill] sm:$0xff] }
 0x1b9   :  { %v2149_v43 = vadd.f32 %v1095_v28, %v1088_v23  ;;  %v2151_v50 = vadd.f32 %v1096_v6, %v1089_v61 }
 0x1bb   :  { %v1103_v45 = vadd.f32 %v2151_v50, %v2149_v43  ;;  %v1106_v54 = vmul.f32 %v2149_v43, %v2149_v43  ;;  %v1107_v9 = vmul.f32 %v2151_v50, %v2151_v50 }
 0x1bd   :  { %1104 = vadd.xlane.f32.xlu0 %v1103_v45  ;;  %v1108_v52 = vadd.f32 %v1107_v9, %v1106_v54  ;;  %v2352_v54 = vld [vmem:[#allocation3_spill] sm:$0xff] }
 0x1bf   :  { %1109 = vadd.xlane.f32.xlu1 %v1108_v52 }
 0x1c1   :  { %795 = vadd.xlane.f32.xlu0 %v794_v18 }
 0x1d0   :  { %203 = vperm.xlu1 %1289, %v193_v31  }
 0x1d7   :  { %196 = vperm.xlu0 %1286, %v189_v12  }
 0x233   :  { %v477_v3 = vpop.xlane.xlu1 %476 }
 0x234   :  { %v484_v41 = vrot.slane %v477_v3, 4 }
 0x236   :  { %v486_v63 = vadd.f32 %v484_v41, %v477_v3 }
 0x237   :  { %v482_v62 = vpop.xlane.xlu1 %481 }
 0x238   :  { %v491_v14 = vmul.f32 0.001953125, %v486_v63  ;;  %v488_v60 = vrot.slane %v482_v62, 4 }
 0x23a   :  { %v490_v0 = vadd.f32 %v488_v60, %v482_v62  ;;  %v493_v11 = vmul.f32 %v491_v14, %v491_v14  ;;  %v1237_v62 = vld [vmem:[%s2314_s4 + $0xc] sm:$0xf] }
 0x23c   :  { %v492_v49 = vmul.f32 0.001953125, %v490_v0  ;;  %v1229_v0 = vld [vmem:[%s2314_s4 + $0x8] sm:$0xf] }
 0x23e   :  { %v494_v16 = vsub.f32 %v492_v49, %v493_v11 }
 0x23f   :  { %v791_v26 = vpop.xlane.xlu0 %790 }
 0x240   :  { %v495_v15 = vmax.f32 %v494_v16, 0.0  ;;  %v798_v35 = vrot.slane %v791_v26, 4  ;;  %v1238_v16 = vld [vmem:[%s2315_s5 + $0xc] sm:$0xf] }
 0x242   :  { %v496_v39 = vadd.f32 1e-05, %v495_v15  ;;  %v800_v37 = vadd.f32 %v798_v35, %v791_v26  ;;  %v1230_v26 = vld [vmem:[%s2315_s5 + $0x8] sm:$0xf] }
 0x244   :  { %1292 = vrsqrt.f32 %v496_v39  ;;  %v805_v24 = vmul.f32 0.001953125, %v800_v37 }
 0x246   :  { %v807_v59 = vmul.f32 %v805_v24, %v805_v24 }
 0x24a   :  { %v1105_v36 = vpop.xlane.xlu0 %1104 }
 0x24b   :  { %v1112_v46 = vrot.slane %v1105_v36, 4 }
 0x24c   :  { %v1110_v56 = vpop.xlane.xlu1 %1109 }
 0x24d   :  { %v1114_v58 = vadd.f32 %v1112_v46, %v1105_v36  ;;  %v1116_v20 = vrot.slane %v1110_v56, 4 }
 0x24e   :  { %v1293_v47 = vpop.eup %1292  ;;  %v796_v5 = vpop.xlane.xlu0 %795 }
 0x24f   :  { %v1119_v38 = vmul.f32 0.001953125, %v1114_v58  ;;  %v1118_v44 = vadd.f32 %v1116_v20, %v1110_v56  ;;  %v802_v30 = vrot.slane %v796_v5, 4  ;;  %v498_v8 = vmul.f32 %v1293_v47, %v1221_v33 }
 0x250   :  { %v204_v7 = vpop.permute.xlu1 %203 }
 0x251   :  { %v1121_v13 = vmul.f32 %v1119_v38, %v1119_v38  ;;  %v1120_v57 = vmul.f32 0.001953125, %v1118_v44  ;;  %v804_v21 = vadd.f32 %v802_v30, %v796_v5  ;;  %v502_v2 = vrot.slane %v498_v8, 4 }
 0x252   :  { %v499_v51 = vmul.f32 %v498_v8, %v491_v14 }
 0x253   :  { %v1122_v25 = vsub.f32 %v1120_v57, %v1121_v13  ;;  %v806_v17 = vmul.f32 0.001953125, %v804_v21  ;;  %v504_v23 = vsel %vm148_vm4, %v498_v8, %v502_v2 }
 0x254   :  { %511 = vperm.xlu0 %1286, %v504_v23   ;;  %v500_v61 = vsub.f32 %v1222_v19, %v499_v51 }
 0x255   :  { %v1123_v10 = vmax.f32 %v1122_v25, 0.0  ;;  %v808_v48 = vsub.f32 %v806_v17, %v807_v59 }
 0x256   :  { %v197_v34 = vpop.permute.xlu0 %196  ;;  %v506_v53 = vrot.slane %v500_v61, 4 }
 0x257   :  { %v1124_v28 = vadd.f32 1e-05, %v1123_v10  ;;  %v809_v6 = vmax.f32 %v808_v48, 0.0  ;;  %v199_v45 = vmul.f32 %v197_v34, %v2351_v4  ;;  %v200_v9 = vmul.f32 %v197_v34, %v2352_v54 }
 0x258   :  { %v508_v52 = vsel %vm148_vm4, %v500_v61, %v506_v53 }
 0x259   :  { %1294 = vrsqrt.f32 %v1124_v28  ;;  %v810_v18 = vadd.f32 1e-05, %v809_v6  ;;  %v2181_v55 = vadd.f32 %v204_v7, %v199_v45  ;;  %v2183_v40 = vadd.f32 %v204_v7, %v200_v9  ;;  %518 = vperm.xlu0 %1286, %v508_v52  }
 0x25b   :  { %1296 = vrsqrt.f32 %v810_v18  ;;  %v2186_v42 = vmul.f32 0.70710677, %v2181_v55  ;;  %v2189_v31 = vmul.f32 0.70710677, %v2183_v40 }
 0x25d   :  { %v216_v22 = vand.u32 2147483647, %v2186_v42  ;;  %v217_v12 = vand.u32 2147483647, %v2189_v31  ;;  %vm213_vm3 = vcmp.lt.f32.partialorder %v2189_v31, 0.0 }
 0x25f   :  { %v218_v3 = vmul.f32 0.3275911, %v216_v22  ;;  %v219_v41 = vmul.f32 0.3275911, %v217_v12  ;;  %v248_v13 = vsub.f32 0.0, %v216_v22 }
 0x261   :  { %v220_v63 = vadd.f32 1.0, %v218_v3  ;;  %v221_v14 = vadd.f32 1.0, %v219_v41  ;;  %v250_v59 = vmul.f32 %v248_v13, %v216_v22 }
 0x263   :  { %v1295_v60 = vpop.eup %1294  ;;  %1298 = vrcp.f32 %v220_v63  ;;  %v252_v48 = vmul.f32 1.442695, %v250_v59 }
 0x264   :  { %1300 = vrcp.f32 %v221_v14  ;;  %v1126_v11 = vmul.f32 %v1295_v60, %v1237_v62 }
 0x265   :  { %v1297_v49 = vpop.eup %1296  ;;  %1302 = vpow2.f32 %v252_v48 }
 0x266   :  { %v812_v15 = vmul.f32 %v1297_v49, %v1229_v0  ;;  %v1127_v39 = vmul.f32 %v1126_v11, %v1119_v38  ;;  %v1130_v33 = vrot.slane %v1126_v11, 4 }
 0x268   :  { %v816_v35 = vrot.slane %v812_v15, 4  ;;  %v1128_v37 = vsub.f32 %v1238_v16, %v1127_v39  ;;  %v813_v36 = vmul.f32 %v812_v15, %v805_v24  ;;  %v1132_v38 = vsel %vm148_vm4, %v1126_v11, %v1130_v33 }
 0x269   :  { %v249_v24 = vsub.f32 0.0, %v217_v12  ;;  %v1353_v11 = vmov 1.0  }
 0x26a   :  { %v818_v46 = vsel %vm148_vm4, %v812_v15, %v816_v35  ;;  %v1134_v56 = vrot.slane %v1128_v37, 4  ;;  %v814_v58 = vsub.f32 %v1230_v26, %v813_v36  ;;  %v215_v15 = vsel %vm213_vm3, -1.0, %v1353_v11 }
 0x26b   :  { %825 = vperm.xlu1 %1289, %v818_v46   ;;  %v251_v17 = vmul.f32 %v249_v24, %v217_v12  ;;  %v208_v35 = vmul.f32 0.5, %v2181_v55  ;;  %v209_v36 = vmul.f32 0.5, %v2183_v40 }
 0x26c   :  { %v1136_v20 = vsel %vm148_vm4, %v1128_v37, %v1134_v56  ;;  %v820_v30 = vrot.slane %v814_v58, 4 }
 0x26d   :  { %v1299_v47 = vpop.eup %1298  ;;  %1146 = vperm.xlu0 %1286, %v1136_v20   ;;  %v254_v53 = vmul.f32 1.442695, %v251_v17 }
 0x26e   :  { %v1301_v5 = vpop.eup %1300  ;;  %v224_v44 = vmul.f32 %v1299_v47, %v220_v63  ;;  %v822_v19 = vsel %vm148_vm4, %v814_v58, %v820_v30  ;;  %vm212_vm4 = vcmp.lt.f32.partialorder %v2186_v42, 0.0 }
 0x26f   :  { %v225_v8 = vmul.f32 %v1301_v5, %v221_v14  ;;  %1139 = vperm.xlu1 %1289, %v1132_v38   ;;  %1304 = vpow2.f32 %v254_v53  ;;  %v1303_v41 = vpop.eup %1302  ;;  %v214_v49 = vsel %vm212_vm4, -1.0, %v1353_v11 }
 0x270   :  { %v226_v57 = vsub.f32 2.0, %v224_v44 }
 0x271   :  { %v227_v21 = vsub.f32 2.0, %v225_v8 }
 0x272   :  { %v228_v2 = vmul.f32 %v1299_v47, %v226_v57 }
 0x273   :  { %v229_v51 = vmul.f32 %v1301_v5, %v227_v21  ;;  %832 = vperm.xlu1 %1289, %v822_v19  }
 0x274   :  { %v230_v25 = vmul.f32 1.0614054, %v228_v2 }
 0x275   :  { %v231_v23 = vmul.f32 1.0614054, %v229_v51 }
 0x276   :  { %v232_v61 = vadd.f32 -1.4531521, %v230_v25 }
 0x277   :  { %v233_v10 = vadd.f32 -1.4531521, %v231_v23 }
 0x278   :  { %v234_v34 = vmul.f32 %v232_v61, %v228_v2 }
 0x279   :  { %v235_v28 = vmul.f32 %v233_v10, %v229_v51  ;;  %v1305_v62 = vpop.eup %1304 }
 0x27a   :  { %v236_v6 = vadd.f32 1.4214138, %v234_v34 }
 0x27b   :  { %v237_v4 = vadd.f32 1.4214138, %v235_v28 }
 0x27c   :  { %v238_v45 = vmul.f32 %v236_v6, %v228_v2 }
 0x27d   :  { %v239_v54 = vmul.f32 %v237_v4, %v229_v51 }
 0x27e   :  { %v240_v9 = vadd.f32 -0.28449672, %v238_v45 }
 0x27f   :  { %v241_v7 = vadd.f32 -0.28449672, %v239_v54 }
 0x280   :  { %v242_v52 = vmul.f32 %v240_v9, %v228_v2 }
 0x281   :  { %v243_v18 = vmul.f32 %v241_v7, %v229_v51 }
 0x282   :  { %v244_v22 = vadd.f32 0.2548296, %v242_v52 }
 0x283   :  { %v245_v3 = vadd.f32 0.2548296, %v243_v18 }
 0x284   :  { %v246_v12 = vmul.f32 %v244_v22, %v228_v2 }
 0x285   :  { %v247_v63 = vmul.f32 %v245_v3, %v229_v51 }
 0x286   :  { %v256_v14 = vmul.f32 %v1303_v41, %v246_v12 }
 0x287   :  { %v257_v60 = vmul.f32 %v1305_v62, %v247_v63 }
 0x288   :  { %v258_v0 = vsub.f32 1.0, %v256_v14 }
 0x289   :  { %v259_v16 = vsub.f32 1.0, %v257_v60 }
 0x28a   :  { %v260_v39 = vmul.f32 %v258_v0, %v214_v49 }
 0x28b   :  { %v261_v26 = vmul.f32 %v259_v16, %v215_v15 }
 0x28c   :  { %v262_v37 = vadd.f32 1.0, %v260_v39 }
 0x28d   :  { %v263_v46 = vadd.f32 1.0, %v261_v26 }
 0x28e   :  { %v264_v42 = vmul.f32 %v262_v37, %v208_v35 }
 0x28f   :  { %v265_v56 = vmul.f32 %v263_v46, %v209_v36 }
 0x290   :  { %266 = vst [vmem:[%s2316_s7] sm:$0xff] %v264_v42 }
 0x291   :  { %267 = vst [vmem:[%s2316_s7 + $0x8] sm:$0xff] %v265_v56 }
 0x2d3   :  { %v512_v31 = vpop.permute.xlu0 %511 }
 0x2d4   :  { %v514_v33 = vmul.f32 %v512_v31, %v2053_v29  ;;  %v515_v58 = vmul.f32 %v512_v31, %v2055_v32 }
 0x2d8   :  { %v519_v55 = vpop.permute.xlu0 %518 }
 0x2d9   :  { %v2223_v20 = vadd.f32 %v519_v55, %v514_v33  ;;  %v2225_v40 = vadd.f32 %v519_v55, %v515_v58 }
 0x2db   :  { %v2228_v47 = vmul.f32 0.70710677, %v2223_v20  ;;  %v2231_v5 = vmul.f32 0.70710677, %v2225_v40 }
 0x2dd   :  { %v531_v44 = vand.u32 2147483647, %v2228_v47  ;;  %v532_v38 = vand.u32 2147483647, %v2231_v5  ;;  %vm527_vm5 = vcmp.lt.f32.partialorder %v2228_v47, 0.0  ;;  %vm528_vm6 = vcmp.lt.f32.partialorder %v2231_v5, 0.0 }
 0x2df   :  { %v533_v30 = vmul.f32 0.3275911, %v531_v44  ;;  %v534_v8 = vmul.f32 0.3275911, %v532_v38  ;;  %v563_v24 = vsub.f32 0.0, %v531_v44  ;;  %v564_v19 = vsub.f32 0.0, %v532_v38 }
 0x2e1   :  { %v535_v29 = vadd.f32 1.0, %v533_v30  ;;  %v536_v13 = vadd.f32 1.0, %v534_v8  ;;  %v565_v48 = vmul.f32 %v563_v24, %v531_v44  ;;  %v566_v6 = vmul.f32 %v564_v19, %v532_v38 }
 0x2e3   :  { %1306 = vrcp.f32 %v535_v29  ;;  %v567_v52 = vmul.f32 1.442695, %v565_v48  ;;  %v569_v12 = vmul.f32 1.442695, %v566_v6  ;;  %v529_v48 = vsel %vm527_vm5, -1.0, %v1353_v11 }
 0x2e4   :  { %1308 = vrcp.f32 %v536_v13 }
 0x2e5   :  { %1310 = vpow2.f32 %v567_v52  ;;  %v523_v52 = vmul.f32 0.5, %v2223_v20 }
 0x2e6   :  { %1312 = vpow2.f32 %v569_v12  ;;  %v524_v12 = vmul.f32 0.5, %v2225_v40 }
 0x2ea   :  { %v826_v32 = vpop.permute.xlu1 %825 }
 0x2eb   :  { %v829_v18 = vmul.f32 %v826_v32, %v2129_v27 }
 0x2ec   :  { %v1147_v61 = vpop.permute.xlu0 %1146 }
 0x2ed   :  { %v1307_v57 = vpop.eup %1306 }
 0x2ee   :  { %v1309_v21 = vpop.eup %1308  ;;  %v539_v2 = vmul.f32 %v1307_v57, %v535_v29  ;;  %v1140_v51 = vpop.permute.xlu1 %1139 }
 0x2ef   :  { %v540_v59 = vmul.f32 %v1309_v21, %v536_v13  ;;  %v1142_v25 = vmul.f32 %v1140_v51, %v2149_v43  ;;  %v1143_v17 = vmul.f32 %v1140_v51, %v2151_v50  ;;  %v828_v43 = vmul.f32 %v826_v32, %v2127_v1  ;;  %v1311_v8 = vpop.eup %1310 }
 0x2f0   :  { %v541_v23 = vsub.f32 2.0, %v539_v2  ;;  %v1313_v32 = vpop.eup %1312 }
 0x2f1   :  { %v542_v10 = vsub.f32 2.0, %v540_v59  ;;  %v2237_v34 = vadd.f32 %v1147_v61, %v1142_v25  ;;  %v2239_v53 = vadd.f32 %v1147_v61, %v1143_v17 }
 0x2f2   :  { %v543_v28 = vmul.f32 %v1307_v57, %v541_v23  ;;  %v833_v54 = vpop.permute.xlu1 %832 }
 0x2f3   :  { %v544_v4 = vmul.f32 %v1309_v21, %v542_v10  ;;  %v2242_v45 = vmul.f32 0.70710677, %v2237_v34  ;;  %v2246_v50 = vmul.f32 0.70710677, %v2239_v53  ;;  %v2251_v63 = vadd.f32 %v833_v54, %v828_v43 }
 0x2f4   :  { %v545_v9 = vmul.f32 1.0614054, %v543_v28  ;;  %v2253_v60 = vadd.f32 %v833_v54, %v829_v18 }
 0x2f5   :  { %v546_v7 = vmul.f32 1.0614054, %v544_v4  ;;  %v1159_v22 = vand.u32 2147483647, %v2242_v45  ;;  %v1160_v41 = vand.u32 2147483647, %v2246_v50 }
 0x2f6   :  { %v547_v3 = vadd.f32 -1.4531521, %v545_v9  ;;  %v2256_v39 = vmul.f32 0.70710677, %v2251_v63  ;;  %v2259_v35 = vmul.f32 0.70710677, %v2253_v60 }
 0x2f7   :  { %v548_v62 = vadd.f32 -1.4531521, %v546_v7  ;;  %v1161_v14 = vmul.f32 0.3275911, %v1159_v22  ;;  %v1162_v0 = vmul.f32 0.3275911, %v1160_v41 }
 0x2f8   :  { %v549_v1 = vmul.f32 %v547_v3, %v543_v28  ;;  %v2262_v42 = vand.u32 2147483647, %v2256_v39  ;;  %v2265_v31 = vand.u32 2147483647, %v2259_v35  ;;  %v1191_v17 = vsub.f32 0.0, %v1159_v22 }
 0x2f9   :  { %v550_v49 = vmul.f32 %v548_v62, %v544_v4  ;;  %v1163_v16 = vadd.f32 1.0, %v1161_v14  ;;  %v1164_v27 = vadd.f32 1.0, %v1162_v0  ;;  %v1192_v10 = vsub.f32 0.0, %v1160_v41 }
 0x2fa   :  { %v551_v15 = vadd.f32 1.4214138, %v549_v1  ;;  %v847_v58 = vmul.f32 0.3275911, %v2262_v42  ;;  %v848_v44 = vmul.f32 0.3275911, %v2265_v31  ;;  %v1193_v7 = vmul.f32 %v1191_v17, %v1159_v22 }
 0x2fb   :  { %v552_v26 = vadd.f32 1.4214138, %v550_v49  ;;  %1314 = vrcp.f32 %v1163_v16  ;;  %v1194_v3 = vmul.f32 %v1192_v10, %v1160_v41  ;;  %v877_v41 = vsub.f32 0.0, %v2262_v42 }
 0x2fc   :  { %v553_v37 = vmul.f32 %v551_v15, %v543_v28  ;;  %1316 = vrcp.f32 %v1164_v27  ;;  %v849_v30 = vadd.f32 1.0, %v847_v58  ;;  %v850_v13 = vadd.f32 1.0, %v848_v44 }
 0x2fd   :  { %v554_v36 = vmul.f32 %v552_v26, %v544_v4  ;;  %v1195_v26 = vmul.f32 1.442695, %v1193_v7  ;;  %v1197_v22 = vmul.f32 1.442695, %v1194_v3  ;;  %vm1155_vm7 = vcmp.lt.f32.partialorder %v2242_v45, 0.0 }
 0x2fe   :  { %v555_v46 = vadd.f32 -0.28449672, %v553_v37  ;;  %1318 = vrcp.f32 %v849_v30  ;;  %vm1156_vm8 = vcmp.lt.f32.partialorder %v2246_v50, 0.0  ;;  %v1151_v45 = vmul.f32 0.5, %v2237_v34 }
 0x2ff   :  { %v556_v56 = vadd.f32 -0.28449672, %v554_v36  ;;  %1320 = vrcp.f32 %v850_v13  ;;  %v1152_v50 = vmul.f32 0.5, %v2239_v53  ;;  %vm841_vm9 = vcmp.lt.f32.partialorder %v2256_v39, 0.0 }
 0x300   :  { %v557_v33 = vmul.f32 %v555_v46, %v543_v28  ;;  %1322 = vpow2.f32 %v1195_v26  ;;  %vm842_vm10 = vcmp.lt.f32.partialorder %v2259_v35, 0.0 }
 0x301   :  { %v558_v55 = vmul.f32 %v556_v56, %v544_v4  ;;  %v878_v56 = vsub.f32 0.0, %v2265_v31  ;;  %1324 = vpow2.f32 %v1197_v22 }
 0x302   :  { %v559_v38 = vadd.f32 0.2548296, %v557_v33 }
 0x303   :  { %v560_v29 = vadd.f32 0.2548296, %v558_v55 }
 0x304   :  { %v561_v57 = vmul.f32 %v559_v38, %v543_v28 }
 0x305   :  { %v1315_v24 = vpop.eup %1314  ;;  %v562_v21 = vmul.f32 %v560_v29, %v544_v4  ;;  %v530_v4 = vsel %vm528_vm6, -1.0, %v1353_v11 }
 0x306   :  { %v1317_v2 = vpop.eup %1316  ;;  %v571_v19 = vmul.f32 %v1311_v8, %v561_v57  ;;  %v1167_v51 = vmul.f32 %v1315_v24, %v1163_v16  ;;  %v879_v8 = vmul.f32 %v877_v41, %v2262_v42 }
 0x307   :  { %v572_v59 = vmul.f32 %v1313_v32, %v562_v21  ;;  %v1168_v25 = vmul.f32 %v1317_v2, %v1164_v27  ;;  %v880_v32 = vmul.f32 %v878_v56, %v2265_v31  ;;  %v843_v56 = vsel %vm841_vm9, -1.0, %v1353_v11 }
 0x308   :  { %v573_v23 = vsub.f32 1.0, %v571_v19  ;;  %v1169_v61 = vsub.f32 2.0, %v1167_v51  ;;  %v1319_v1 = vpop.eup %1318 }
 0x309   :  { %v574_v28 = vsub.f32 1.0, %v572_v59  ;;  %v1170_v6 = vsub.f32 2.0, %v1168_v25  ;;  %v1321_v16 = vpop.eup %1320  ;;  %v853_v37 = vmul.f32 %v1319_v1, %v849_v30  ;;  %v881_v59 = vmul.f32 1.442695, %v879_v8 }
 0x30a   :  { %v575_v54 = vmul.f32 %v573_v23, %v529_v48  ;;  %v1171_v9 = vmul.f32 %v1315_v24, %v1169_v61  ;;  %v854_v36 = vmul.f32 %v1321_v16, %v850_v13  ;;  %v883_v23 = vmul.f32 1.442695, %v880_v32 }
 0x30b   :  { %v576_v43 = vmul.f32 %v574_v28, %v530_v4  ;;  %v1172_v47 = vmul.f32 %v1317_v2, %v1170_v6  ;;  %v855_v46 = vsub.f32 2.0, %v853_v37  ;;  %1326 = vpow2.f32 %v881_v59  ;;  %v1323_v4 = vpop.eup %1322 }
 0x30c   :  { %v577_v5 = vadd.f32 1.0, %v575_v54  ;;  %v1173_v18 = vmul.f32 1.0614054, %v1171_v9  ;;  %v856_v58 = vsub.f32 2.0, %v854_v36  ;;  %1328 = vpow2.f32 %v883_v23 }
 0x30d   :  { %v578_v62 = vadd.f32 1.0, %v576_v43  ;;  %v1174_v14 = vmul.f32 1.0614054, %v1172_v47  ;;  %v857_v44 = vmul.f32 %v1319_v1, %v855_v46  ;;  %v1325_v43 = vpop.eup %1324  ;;  %v1158_v1 = vsel %vm1156_vm8, -1.0, %v1353_v11 }
 0x30e   :  { %v579_v0 = vmul.f32 %v577_v5, %v523_v52  ;;  %v1175_v49 = vadd.f32 -1.4531521, %v1173_v18  ;;  %v858_v30 = vmul.f32 %v1321_v16, %v856_v58  ;;  %v844_v58 = vsel %vm842_vm10, -1.0, %v1353_v11 }
 0x30f   :  { %v580_v15 = vmul.f32 %v578_v62, %v524_v12  ;;  %v1176_v27 = vadd.f32 -1.4531521, %v1174_v14  ;;  %v859_v13 = vmul.f32 1.0614054, %v857_v44  ;;  %v1157_v62 = vsel %vm1155_vm7, -1.0, %v1353_v11 }
 0x310   :  { %1223 = vst [vmem:[%s2316_s7 + $0x10] sm:$0xff] %v579_v0  ;;  %v1177_v20 = vmul.f32 %v1175_v49, %v1171_v9  ;;  %v860_v24 = vmul.f32 1.0614054, %v858_v30 }
 0x311   :  { %1224 = vst [vmem:[%s2316_s7 + $0x18] sm:$0xff] %v580_v15  ;;  %v1178_v40 = vmul.f32 %v1176_v27, %v1172_v47  ;;  %v861_v2 = vadd.f32 -1.4531521, %v859_v13 }
 0x312   :  { %v1179_v33 = vadd.f32 1.4214138, %v1177_v20  ;;  %v862_v51 = vadd.f32 -1.4531521, %v860_v24 }
 0x313   :  { %v1180_v55 = vadd.f32 1.4214138, %v1178_v40  ;;  %v863_v17 = vmul.f32 %v861_v2, %v857_v44 }
 0x314   :  { %v1181_v38 = vmul.f32 %v1179_v33, %v1171_v9  ;;  %v864_v10 = vmul.f32 %v862_v51, %v858_v30 }
 0x315   :  { %v1182_v29 = vmul.f32 %v1180_v55, %v1172_v47  ;;  %v865_v28 = vadd.f32 1.4214138, %v863_v17  ;;  %v1327_v20 = vpop.eup %1326 }
 0x316   :  { %v1183_v57 = vadd.f32 -0.28449672, %v1181_v38  ;;  %v866_v42 = vadd.f32 1.4214138, %v864_v10  ;;  %v1329_v41 = vpop.eup %1328 }
 0x317   :  { %v1184_v21 = vadd.f32 -0.28449672, %v1182_v29  ;;  %v867_v31 = vmul.f32 %v865_v28, %v857_v44 }
 0x318   :  { %v1185_v19 = vmul.f32 %v1183_v57, %v1171_v9  ;;  %v868_v52 = vmul.f32 %v866_v42, %v858_v30 }
 0x319   :  { %v1186_v25 = vmul.f32 %v1184_v21, %v1172_v47  ;;  %v869_v18 = vadd.f32 -0.28449672, %v867_v31 }
 0x31a   :  { %v1187_v61 = vadd.f32 0.2548296, %v1185_v19  ;;  %v870_v12 = vadd.f32 -0.28449672, %v868_v52 }
 0x31b   :  { %v1188_v48 = vadd.f32 0.2548296, %v1186_v25  ;;  %v871_v14 = vmul.f32 %v869_v18, %v857_v44 }
 0x31c   :  { %v1189_v6 = vmul.f32 %v1187_v61, %v1171_v9  ;;  %v872_v0 = vmul.f32 %v870_v12, %v858_v30 }
 0x31d   :  { %v1190_v54 = vmul.f32 %v1188_v48, %v1172_v47  ;;  %v873_v16 = vadd.f32 0.2548296, %v871_v14 }
 0x31e   :  { %v1199_v7 = vmul.f32 %v1323_v4, %v1189_v6  ;;  %v874_v27 = vadd.f32 0.2548296, %v872_v0 }
 0x31f   :  { %v1200_v5 = vmul.f32 %v1325_v43, %v1190_v54  ;;  %v875_v37 = vmul.f32 %v873_v16, %v857_v44  ;;  %v837_v44 = vmul.f32 0.5, %v2251_v63 }
 0x320   :  { %v1201_v3 = vsub.f32 1.0, %v1199_v7  ;;  %v876_v36 = vmul.f32 %v874_v27, %v858_v30  ;;  %v838_v30 = vmul.f32 0.5, %v2253_v60 }
 0x321   :  { %v1202_v9 = vsub.f32 1.0, %v1200_v5  ;;  %v885_v46 = vmul.f32 %v1327_v20, %v875_v37 }
 0x322   :  { %v1203_v47 = vmul.f32 %v1201_v3, %v1157_v62  ;;  %v886_v34 = vmul.f32 %v1329_v41, %v876_v36 }
 0x323   :  { %v1204_v49 = vmul.f32 %v1202_v9, %v1158_v1  ;;  %v887_v53 = vsub.f32 1.0, %v885_v46 }
 0x324   :  { %v1205_v15 = vadd.f32 1.0, %v1203_v47  ;;  %v888_v33 = vsub.f32 1.0, %v886_v34 }
 0x325   :  { %v1206_v26 = vadd.f32 1.0, %v1204_v49  ;;  %v889_v55 = vmul.f32 %v887_v53, %v843_v56 }
 0x326   :  { %v1207_v22 = vmul.f32 %v1205_v15, %v1151_v45  ;;  %v890_v39 = vmul.f32 %v888_v33, %v844_v58 }
 0x327   :  { %v1208_v40 = vmul.f32 %v1206_v26, %v1152_v50  ;;  %v891_v38 = vadd.f32 1.0, %v889_v55 }
 0x328   :  { %1239 = vst [vmem:[%s2316_s7 + $0x30] sm:$0xff] %v1207_v22  ;;  %v892_v8 = vadd.f32 1.0, %v890_v39 }
 0x329   :  { %1240 = vst [vmem:[%s2316_s7 + $0x38] sm:$0xff] %v1208_v40  ;;  %v893_v35 = vmul.f32 %v891_v38, %v837_v44 }
 0x32a   :  { %v894_v29 = vmul.f32 %v892_v8, %v838_v30 }
 0x32b   :  { %1231 = vst [vmem:[%s2316_s7 + $0x20] sm:$0xff] %v893_v35 }
 0x32c   :  { %1232 = vst [vmem:[%s2316_s7 + $0x28] sm:$0xff] %v894_v29 }

</bundles_post_ra>
